<compile_context>
chip_gen: v7x
topology: tpu7x:2x2x1
jax: 0.10.0
libtpu: 0.0.40
codegen_flags: <defaults>
</compile_context>

<pallas_src>
import functools
import math
import random

import numpy as np

import jax
import jax.numpy as jnp
from jax import lax
from jax.experimental import pallas as pl
from jax.experimental.pallas import tpu as pltpu


_CHUNK = 8        # time-loop unroll; == f32 sublane count
_MAX_TILE = 512   # max rows of U / states resident per grid step (multiple of _CHUNK)


def _round_up(n, m):
    return ((n + m - 1) // m) * m


def _plan_time(T, chunk=_CHUNK, max_tile=_MAX_TILE):
    """Pick a time-tile height (multiple of `chunk`) and padded sequence length."""
    Tc = _round_up(max(int(T), 1), chunk)
    tile = min(Tc, max_tile)
    Tp = _round_up(Tc, tile)
    return tile, Tp


def _vmem_limit_bytes():
    """Generation-aware scoped-VMEM ceiling (v7x only has 64 MiB physical)."""
    cap = 32 * 1024 * 1024
    try:
        cap = int(getattr(pltpu.get_tpu_info(), "vmem_capacity_bytes", cap))
    except Exception:
        pass
    return max(32 * 1024 * 1024, min(3 * cap // 4, 100 * 1024 * 1024))


def _pad2(a, rows, cols, fill=0.0):
    r, c = a.shape
    if r == rows and c == cols:
        return a
    return jnp.pad(a, ((0, rows - r), (0, cols - c)), constant_values=fill)


# ----------------------------- Pallas kernels ------------------------------ #

def _esn_state_kernel(x_ref, win_ref, w_ref, gain_ref, bias_ref, h0_ref,
                      states_ref, state_sc, u_sc, *, leaking_rate, chunk):
    """One time-tile of the reservoir recurrence.

    state_t = (1-a)*state_{t-1} + a*tanh(gain*(u_t + state_{t-1}@W) + bias)
    gain/bias are folded into u' = gain*U + bias and W' = W*gain once per tile
    so the serial per-step work is only tanh(u'_t + s@W') plus the blend.
    The running state is carried across grid steps in `state_sc`.
    """
    @pl.when(pl.program_id(0) == 0)
    def _():
        state_sc[...] = h0_ref[...]

    gain = gain_ref[...]
    bias = bias_ref[...]
    # Hoisted input projection for the whole tile: one MXU matmul (kept f32;
    # K = D+1 is tiny so this is one-off and off the per-step critical path).
    u_sc[...] = jnp.dot(x_ref[...], win_ref[...],
                        preferred_element_type=jnp.float32) * gain + bias
    # W' = W*gain (column scale), cast once to bf16 -> single MXU pass per step.
    # TODO(synk): keep W' resident in MXU weight registers across steps via
    # pltpu.matmul_push_rhs / matmul_acc_lhs / matmul_pop.
    w_bf = (w_ref[...] * gain).astype(jnp.bfloat16)

    a = leaking_rate
    n_chunks = u_sc.shape[0] // chunk

    def outer(c, state):
        base = pl.multiple_of(c * chunk, chunk)
        u_chunk = u_sc[pl.ds(base, chunk), :]          # one (chunk, R) load
        st = state
        for j in range(chunk):                          # static unroll
            sba = u_chunk[j:j + 1, :] + jnp.dot(
                st.astype(jnp.bfloat16), w_bf,
                preferred_element_type=jnp.float32)
            st = (1.0 - a) * st + a * jnp.tanh(sba)     # f32 VPU/EUP
            states_ref[pl.ds(base + j, 1), :] = st      # direct row store (vst slot)
        return st

    state_sc[...] = lax.fori_loop(0, n_chunks, outer, state_sc[...])


def _esn_ip_train_kernel(x_ref, win_ref, w_ref, gain_in_ref, bias_in_ref, h0_ref,
                         gain_out_ref, bias_out_ref, dg2_ref, db2_ref,
                         state_sc, gain_sc, bias_sc, u_sc,
                         *, leaking_rate, eta, mu, sigma, chunk, t_valid, r_valid):
    """One time-tile of an intrinsic-plasticity training epoch.

    Same recurrence plus per-step gain/bias updates (skipped for t == 0 and for
    padded time steps, as in the PyTorch code).  gain cannot be folded into W
    here because it changes every step.  States are not materialized; outputs
    are the updated gain/bias and squared update norms for the host-side
    convergence check.
    """
    i = pl.program_id(0)
    tile = u_sc.shape[0]

    @pl.when(i == 0)
    def _():
        state_sc[...] = h0_ref[...]
        gain_sc[...] = gain_in_ref[...]
        bias_sc[...] = bias_in_ref[...]

    u_sc[...] = jnp.dot(x_ref[...], win_ref[...],
                        preferred_element_type=jnp.float32)
    w_bf = w_ref[...].astype(jnp.bfloat16)   # hoisted bf16 weight operand

    a = leaking_rate
    sigma2 = sigma * sigma
    inv_sigma2 = 1.0 / sigma2
    n_chunks = tile // chunk
    t_off = i * tile

    def outer(c, carry):
        state, gain, bias = carry
        base = pl.multiple_of(c * chunk, chunk)
        u_chunk = u_sc[pl.ds(base, chunk), :]
        for j in range(chunk):                          # static unroll
            t = t_off + base + j
            sba = u_chunk[j:j + 1, :] + jnp.dot(
                state.astype(jnp.bfloat16), w_bf,
                preferred_element_type=jnp.float32)
            state = (1.0 - a) * state + a * jnp.tanh(gain * sba + bias)
            delta_bias = -eta * (-mu * inv_sigma2
                                 + state * (2.0 * sigma2 + 1.0
                                            - state * state
                                            + mu * state) * inv_sigma2)
            # exact divide: approx reciprocal error would compound over T*epochs
            delta_gain = eta / gain + delta_bias * sba
            # t == 0 does not update IP params; padded steps masked too
            m = jnp.logical_and(t > 0, t < t_valid).astype(jnp.float32)
            gain = gain + m * delta_gain
            bias = bias + m * delta_bias
        return (state, gain, bias)

    state, gain, bias = lax.fori_loop(
        0, n_chunks, outer, (state_sc[...], gain_sc[...], bias_sc[...]))
    state_sc[...] = state
    gain_sc[...] = gain
    bias_sc[...] = bias

    @pl.when(i == pl.num_programs(0) - 1)
    def _():
        gain_out_ref[...] = gain
        bias_out_ref[...] = bias
        # squared update norms over the valid reservoir columns only
        col = lax.broadcasted_iota(jnp.int32, gain.shape, 1)
        cm = (col < r_valid).astype(jnp.float32)
        dg = (gain - gain_in_ref[...]) * cm
        db = (bias - bias_in_ref[...]) * cm
        dg2_ref[...] = jnp.sum(dg * dg, axis=1, keepdims=True)
        db2_ref[...] = jnp.sum(db * db, axis=1, keepdims=True)


# ------------------------- cached pallas_call builders ---------------------- #

@functools.lru_cache(maxsize=None)
def _state_fn(T, D1, R, leaking_rate):
    tile, Tp = _plan_time(T)
    Rp = _round_up(R, 128)
    n_tiles = Tp // tile
    kernel = functools.partial(_esn_state_kernel,
                               leaking_rate=leaking_rate, chunk=_CHUNK)
    rep = lambda i: (0, 0)   # parameter blocks: resident across the whole grid
    grid_spec = pltpu.PrefetchScalarGridSpec(
        num_scalar_prefetch=0,
        grid=(n_tiles,),
        in_specs=[pl.BlockSpec((tile, D1), lambda i: (i, 0)),
                  pl.BlockSpec((D1, Rp), rep),
                  pl.BlockSpec((Rp, Rp), rep),
                  pl.BlockSpec((1, Rp), rep),
                  pl.BlockSpec((1, Rp), rep),
                  pl.BlockSpec((1, Rp), rep)],
        out_specs=pl.BlockSpec((tile, Rp), lambda i: (i, 0)),
        scratch_shapes=[pltpu.VMEM((1, Rp), jnp.float32),       # running state
                        pltpu.VMEM((tile, Rp), jnp.float32)],   # per-tile U'
    )
    call = pl.pallas_call(
        kernel,
        out_shape=jax.ShapeDtypeStruct((Tp, Rp), jnp.float32),
        grid_spec=grid_spec,
        compiler_params=pltpu.CompilerParams(
            dimension_semantics=("arbitrary",),
            vmem_limit_bytes=_vmem_limit_bytes()),
    )

    def fn(x_aug, win, w, gain, bias, h0):
        states = call(_pad2(x_aug, Tp, D1),
                      _pad2(win, D1, Rp),
                      _pad2(w, Rp, Rp),
                      _pad2(gain, 1, Rp, 1.0),   # pad gain with 1 (padded cols stay inert)
                      _pad2(bias, 1, Rp),
                      _pad2(h0, 1, Rp))
        return states[:T, :R]

    return jax.jit(fn)


@functools.lru_cache(maxsize=None)
def _ip_train_fn(T, D1, R, leaking_rate, eta, mu, sigma):
    tile, Tp = _plan_time(T)
    Rp = _round_up(R, 128)
    n_tiles = Tp // tile
    kernel = functools.partial(_esn_ip_train_kernel,
                               leaking_rate=leaking_rate, eta=eta, mu=mu,
                               sigma=sigma, chunk=_CHUNK, t_valid=T, r_valid=R)
    rep = lambda i: (0, 0)
    grid_spec = pltpu.PrefetchScalarGridSpec(
        num_scalar_prefetch=0,
        grid=(n_tiles,),
        in_specs=[pl.BlockSpec((tile, D1), lambda i: (i, 0)),
                  pl.BlockSpec((D1, Rp), rep),
                  pl.BlockSpec((Rp, Rp), rep),
                  pl.BlockSpec((1, Rp), rep),
                  pl.BlockSpec((1, Rp), rep),
                  pl.BlockSpec((1, Rp), rep)],
        out_specs=(pl.BlockSpec((1, Rp), rep),
                   pl.BlockSpec((1, Rp), rep),
                   pl.BlockSpec((1, 1), rep),
                   pl.BlockSpec((1, 1), rep)),
        scratch_shapes=[pltpu.VMEM((1, Rp), jnp.float32),       # state carry
                        pltpu.VMEM((1, Rp), jnp.float32),       # gain carry
                        pltpu.VMEM((1, Rp), jnp.float32),       # bias carry
                        pltpu.VMEM((tile, Rp), jnp.float32)],   # per-tile U
    )
    call = pl.pallas_call(
        kernel,
        out_shape=(jax.ShapeDtypeStruct((1, Rp), jnp.float32),
                   jax.ShapeDtypeStruct((1, Rp), jnp.float32),
                   jax.ShapeDtypeStruct((1, 1), jnp.float32),
                   jax.ShapeDtypeStruct((1, 1), jnp.float32)),
        grid_spec=grid_spec,
        compiler_params=pltpu.CompilerParams(
            dimension_semantics=("arbitrary",),
            vmem_limit_bytes=_vmem_limit_bytes()),
    )

    def fn(x_aug, win, w, gain, bias, h0):
        g, b, dg2, db2 = call(_pad2(x_aug, Tp, D1),
                              _pad2(win, D1, Rp),
                              _pad2(w, Rp, Rp),
                              _pad2(gain, 1, Rp, 1.0),
                              _pad2(bias, 1, Rp),
                              _pad2(h0, 1, Rp))
        return g[:, :R], b[:, :R], dg2, db2

    return jax.jit(fn)


# --------------------------------- ESN class -------------------------------- #

class ESN:
    """JAX/Pallas port of the PyTorch ESN module (forward-pass semantics)."""

    def __init__(self, input, reservoir, sr, scale_in, leaking_rate, density,
                 Nepochs, eta, mu, sigma, threshold,
                 Win_assign='Uniform', W_assign='Uniform', seed=0,
                 check_every=1):
        self.input = input
        self.reservoir = reservoir
        self.spectral_radius = sr
        self.density = density
        self.scale_in = scale_in
        self.leaking_rate = leaking_rate
        self.Win_assigned = Win_assign
        self.W_assigned = W_assign
        self.Nepochs = Nepochs
        self.threshold = threshold
        self.eta = eta
        self.mu = mu
        self.sigma = sigma
        self._seed = seed
        # epochs between host-side convergence checks (1 == PyTorch semantics)
        self.check_every = max(1, int(check_every))
        self.reset_parameters()

    def reset_parameters(self):
        # deterministic (seeded) variant of the numpy init in the PyTorch module
        rng = np.random.RandomState(self._seed)
        pyrng = random.Random(self._seed)

        if self.Win_assigned == 'Uniform':
            Win_np = rng.uniform(-self.scale_in, self.scale_in,
                                 size=(self.input + 1, self.reservoir))
        elif self.Win_assigned == 'Xvaier':
            Win_np = (rng.randn(self.input + 1, self.reservoir)
                      / np.sqrt(self.input + 1) * self.scale_in)
        else:  # 'Guassian'
            Win_np = rng.randn(self.input + 1, self.reservoir) * self.scale_in

        if self.density < 1:
            W_np = np.zeros((self.reservoir, self.reservoir))
            for row in range(self.reservoir):
                n_row = int(round(self.density * self.reservoir))
                cols = pyrng.sample(range(self.reservoir), n_row)
                W_np[row, cols] = rng.uniform(-1, 1, size=(1, n_row))
        else:
            W_np = rng.uniform(-1, 1, size=(self.reservoir, self.reservoir))

        Ws = ((1 - self.leaking_rate) * np.eye(self.reservoir)
              + self.leaking_rate * W_np)
        actual_sr = np.max(np.abs(np.linalg.eigvals(Ws)))
        Ws = Ws * self.spectral_radius / actual_sr
        W_np = (Ws - (1.0 - self.leaking_rate) * np.eye(self.reservoir)) / self.leaking_rate

        self.Win = jnp.asarray(Win_np, dtype=jnp.float32)
        self.W = jnp.asarray(W_np, dtype=jnp.float32)
        self.gain = jnp.ones((1, self.reservoir), dtype=jnp.float32)
        self.bias = jnp.zeros((1, self.reservoir), dtype=jnp.float32)

    # glue: append the constant +1 bias input column (outside the kernel)
    def _augment(self, x):
        x = jnp.asarray(x, dtype=jnp.float32)
        ones = jnp.ones((x.shape[0], 1), dtype=jnp.float32)
        return jnp.concatenate((x, ones), axis=1)

    def forward(self, input, h_0=None, useIP=True, IPmode='training'):
        if useIP and IPmode == 'training':
            self.computeIntrinsicPlasticity(input)
            return None
        if useIP and IPmode == 'testing':
            return self.computeState(input, h_0=h_0, useIP=True)
        return self.computeState(input, h_0=h_0, useIP=False)

    __call__ = forward

    def computeIntrinsicPlasticity(self, input):
        x_aug = self._augment(input)
        T, D1 = x_aug.shape
        R = self.reservoir
        h0 = jnp.zeros((1, R), dtype=jnp.float32)
        thr2 = float(self.threshold) ** 2
        fn = _ip_train_fn(T, D1, R, float(self.leaking_rate), float(self.eta),
                          float(self.mu), float(self.sigma))
        for epoch in range(self.Nepochs):
            self.gain, self.bias, dg2, db2 = fn(
                x_aug, self.Win, self.W, self.gain, self.bias, h0)
            if (epoch + 1) % self.check_every == 0 or epoch + 1 == self.Nepochs:
                dg2_h, db2_h = jax.device_get((dg2, db2))
                if dg2_h[0, 0] < thr2 and db2_h[0, 0] < thr2:
                    break

    def computeState(self, input, h_0=None, useIP=False, return_list=False):
        x_aug = self._augment(input)
        T, D1 = x_aug.shape
        R = self.reservoir
        if h_0 is None:
            h_0 = jnp.zeros((1, R), dtype=jnp.float32)
        else:
            h_0 = jnp.asarray(h_0, dtype=jnp.float32).reshape(1, R)
        fn = _state_fn(T, D1, R, float(self.leaking_rate))
        if useIP:
            gain, bias = self.gain, self.bias
        else:
            # plain tanh(.) == gain 1, bias 0; the fold then is the identity
            gain = jnp.ones((1, R), dtype=jnp.float32)
            bias = jnp.zeros((1, R), dtype=jnp.float32)
        states = fn(x_aug, self.Win, self.W, gain, bias, h_0)
        if return_list:
            # PyTorch-style: list of (1, reservoir) arrays, one per time step
            return [states[t:t + 1] for t in range(T)]
        return states   # (T, reservoir): the same states stacked along dim 0


# ---------------------------------- demo ------------------------------------ #

if __name__ == "__main__":
    # R is a multiple of 128 so the reservoir dimension fills the 128 lanes.
    T, D, R = 64, 4, 128
    esn = ESN(input=D, reservoir=R, sr=0.9, scale_in=1.0, leaking_rate=0.3,
              density=0.5, Nepochs=2, eta=1e-4, mu=0.0, sigma=0.2,
              threshold=1e-8, Win_assign='Uniform', W_assign='Uniform', seed=0)

    x = jax.random.normal(jax.random.PRNGKey(0), (T, D), dtype=jnp.float32)

    # IP training (updates gain/bias via the training kernel, returns None)
    esn(x, useIP=True, IPmode='training')

    # IP testing pass (recurrence kernel with learned gain/bias folded in)
    states_ip = esn(x, useIP=True, IPmode='testing')

    # plain reservoir pass (no IP)
    states_plain = esn(x, useIP=False)

    jax.block_until_ready(states_ip)
    jax.block_until_ready(states_plain)
    assert states_ip.shape == (T, R)
    assert states_plain.shape == (T, R)
    assert bool(jnp.all(jnp.isfinite(esn.gain))) and bool(jnp.all(jnp.isfinite(esn.bias)))

    # numpy references (float64)
    Win_np = np.asarray(esn.Win, dtype=np.float64)
    W_np = np.asarray(esn.W, dtype=np.float64)
    gain_np = np.asarray(esn.gain, dtype=np.float64)
    bias_np = np.asarray(esn.bias, dtype=np.float64)
    a = float(esn.leaking_rate)
    xa = np.concatenate([np.asarray(x, dtype=np.float64),
                         np.ones((T, 1), dtype=np.float64)], axis=1)

    def ref_states(g, b):
        st = np.zeros((1, R), dtype=np.float64)
        rows = []
        for t in range(T):
            sba = xa[t:t + 1] @ Win_np + st @ W_np
            st = (1.0 - a) * st + a * np.tanh(g * sba + b)
            rows.append(st)
        return np.concatenate(rows, axis=0)

    ref_plain = ref_states(1.0, 0.0)
    ref_ip = ref_states(gain_np, bias_np)

    err_plain = float(np.max(np.abs(np.asarray(states_plain, np.float64) - ref_plain)))
    err_ip = float(np.max(np.abs(np.asarray(states_ip, np.float64) - ref_ip)))
    assert math.isfinite(err_plain) and err_plain < 3e-2, f"plain max abs err: {err_plain}"
    assert math.isfinite(err_ip) and err_ip < 3e-2, f"IP-test max abs err: {err_ip}"

    print("KERNEL_OK")
</pallas_src>

<mosaic_0001>
module attributes {stable_mosaic.version = 11 : i64} {
  func.func @_esn_ip_train_kernel(%arg0: i32, %arg1: memref<64x5xf32, #tpu.memory_space<vmem>>, %arg2: memref<5x128xf32, #tpu.memory_space<vmem>>, %arg3: memref<128x128xf32, #tpu.memory_space<vmem>>, %arg4: memref<1x128xf32, #tpu.memory_space<vmem>>, %arg5: memref<1x128xf32, #tpu.memory_space<vmem>>, %arg6: memref<1x128xf32, #tpu.memory_space<vmem>>, %arg7: memref<1x128xf32, #tpu.memory_space<vmem>>, %arg8: memref<1x128xf32, #tpu.memory_space<vmem>>, %arg9: memref<1x1xf32, #tpu.memory_space<vmem>>, %arg10: memref<1x1xf32, #tpu.memory_space<vmem>>, %arg11: memref<1x128xf32, #tpu.memory_space<vmem>>, %arg12: memref<1x128xf32, #tpu.memory_space<vmem>>, %arg13: memref<1x128xf32, #tpu.memory_space<vmem>>, %arg14: memref<64x128xf32, #tpu.memory_space<vmem>>) attributes {dimension_semantics = [#tpu.dimension_semantics<arbitrary>], iteration_bounds = array<i64: 1>, scalar_prefetch = 0 : i64, scratch_operands = 4 : i64, tpu.core_type = #tpu.core_type<tc>, window_params = [{transform_indices = @transform_0, window_bounds = array<i64: 64, 5>}, {pipeline_mode = #tpu.pipeline_mode<synchronous>, transform_indices = @transform_1, window_bounds = array<i64: 5, 128>}, {pipeline_mode = #tpu.pipeline_mode<synchronous>, transform_indices = @transform_2, window_bounds = array<i64: 128, 128>}, {pipeline_mode = #tpu.pipeline_mode<synchronous>, transform_indices = @transform_3, window_bounds = array<i64: 1, 128>}, {pipeline_mode = #tpu.pipeline_mode<synchronous>, transform_indices = @transform_4, window_bounds = array<i64: 1, 128>}, {pipeline_mode = #tpu.pipeline_mode<synchronous>, transform_indices = @transform_5, window_bounds = array<i64: 1, 128>}, {pipeline_mode = #tpu.pipeline_mode<synchronous>, transform_indices = @transform_6, window_bounds = array<i64: 1, 128>}, {pipeline_mode = #tpu.pipeline_mode<synchronous>, transform_indices = @transform_7, window_bounds = array<i64: 1, 128>}, {pipeline_mode = #tpu.pipeline_mode<synchronous>, transform_indices = @transform_8, window_bounds = array<i64: 1, 1>}, {pipeline_mode = #tpu.pipeline_mode<synchronous>, transform_indices = @transform_9, window_bounds = array<i64: 1, 1>}]} {
    %c0_i32 = arith.constant 0 : i32
    %0 = arith.cmpi eq, %arg0, %c0_i32 : i32
    %1 = arith.extui %0 : i1 to i32
    %c0_i32_0 = arith.constant 0 : i32
    %2 = arith.cmpi ne, %1, %c0_i32_0 : i32
    scf.if %2 {
      %c0_24 = arith.constant 0 : index
      %c0_25 = arith.constant 0 : index
      %21 = vector.load %arg6[%c0_24, %c0_25] : memref<1x128xf32, #tpu.memory_space<vmem>>, vector<1x128xf32>
      %c0_26 = arith.constant 0 : index
      %c0_27 = arith.constant 0 : index
      %22 = vector.load %arg11[%c0_26, %c0_27] : memref<1x128xf32, #tpu.memory_space<vmem>>, vector<1x128xf32>
      tpu.vector_store %arg11[%c0_26, %c0_27], %21 {strides = array<i32>} : memref<1x128xf32, #tpu.memory_space<vmem>>, vector<1x128xf32>,
      %c0_28 = arith.constant 0 : index
      %c0_29 = arith.constant 0 : index
      %23 = vector.load %arg4[%c0_28, %c0_29] : memref<1x128xf32, #tpu.memory_space<vmem>>, vector<1x128xf32>
      %c0_30 = arith.constant 0 : index
      %c0_31 = arith.constant 0 : index
      %24 = vector.load %arg12[%c0_30, %c0_31] : memref<1x128xf32, #tpu.memory_space<vmem>>, vector<1x128xf32>
      tpu.vector_store %arg12[%c0_30, %c0_31], %23 {strides = array<i32>} : memref<1x128xf32, #tpu.memory_space<vmem>>, vector<1x128xf32>,
      %c0_32 = arith.constant 0 : index
      %c0_33 = arith.constant 0 : index
      %25 = vector.load %arg5[%c0_32, %c0_33] : memref<1x128xf32, #tpu.memory_space<vmem>>, vector<1x128xf32>
      %c0_34 = arith.constant 0 : index
      %c0_35 = arith.constant 0 : index
      %26 = vector.load %arg13[%c0_34, %c0_35] : memref<1x128xf32, #tpu.memory_space<vmem>>, vector<1x128xf32>
      tpu.vector_store %arg13[%c0_34, %c0_35], %25 {strides = array<i32>} : memref<1x128xf32, #tpu.memory_space<vmem>>, vector<1x128xf32>,
    } else {
    }
    %c0 = arith.constant 0 : index
    %c0_1 = arith.constant 0 : index
    %3 = vector.load %arg1[%c0, %c0_1] : memref<64x5xf32, #tpu.memory_space<vmem>>, vector<64x5xf32>
    %c0_2 = arith.constant 0 : index
    %c0_3 = arith.constant 0 : index
    %4 = vector.load %arg2[%c0_2, %c0_3] : memref<5x128xf32, #tpu.memory_space<vmem>>, vector<5x128xf32>
    %cst = arith.constant dense<0.000000e+00> : vector<64x128xf32>
    %5 = tpu.matmul %3, %4, %cst {dimension_numbers = #tpu.dot_dimension_numbers<[1], [0], [0], [1], [0, 0, 1, 1], [], []>} : vector<64x5xf32>, vector<5x128xf32>, vector<64x128xf32> -> vector<64x128xf32>
    %c0_4 = arith.constant 0 : index
    %c0_5 = arith.constant 0 : index
    %6 = vector.load %arg14[%c0_4, %c0_5] : memref<64x128xf32, #tpu.memory_space<vmem>>, vector<64x128xf32>
    tpu.vector_store %arg14[%c0_4, %c0_5], %5 {strides = array<i32>} : memref<64x128xf32, #tpu.memory_space<vmem>>, vector<64x128xf32>,
    %c0_6 = arith.constant 0 : index
    %c0_7 = arith.constant 0 : index
    %7 = vector.load %arg3[%c0_6, %c0_7] : memref<128x128xf32, #tpu.memory_space<vmem>>, vector<128x128xf32>
    %8 = arith.truncf %7 : vector<128x128xf32> to vector<128x128xbf16>
    %c64_i32 = arith.constant 64 : i32
    %9 = arith.muli %arg0, %c64_i32 : i32
    %c0_8 = arith.constant 0 : index
    %c0_9 = arith.constant 0 : index
    %10 = vector.load %arg11[%c0_8, %c0_9] : memref<1x128xf32, #tpu.memory_space<vmem>>, vector<1x128xf32>
    %c0_10 = arith.constant 0 : index
    %c0_11 = arith.constant 0 : index
    %11 = vector.load %arg12[%c0_10, %c0_11] : memref<1x128xf32, #tpu.memory_space<vmem>>, vector<1x128xf32>
    %c0_12 = arith.constant 0 : index
    %c0_13 = arith.constant 0 : index
    %12 = vector.load %arg13[%c0_12, %c0_13] : memref<1x128xf32, #tpu.memory_space<vmem>>, vector<1x128xf32>
    %c0_i32_14 = arith.constant 0 : i32
    %c8_i32 = arith.constant 8 : i32
    %13 = arith.addi %c0_i32_14, %c8_i32 : i32
    %c1_i32 = arith.constant 1 : i32
    %14:3 = scf.for %arg15 = %c0_i32_14 to %13 step %c1_i32 iter_args(%arg16 = %10, %arg17 = %11, %arg18 = %12) -> (vector<1x128xf32>, vector<1x128xf32>, vector<1x128xf32>)  : i32 {
      %c8_i32_24 = arith.constant 8 : i32
      %21 = arith.muli %arg15, %c8_i32_24 : i32
      %22 = tpu.assume_multiple %21, 8 : i32
      %23 = arith.index_cast %22 : i32 to index
      %c0_25 = arith.constant 0 : index
      %24 = vector.load %arg14[%23, %c0_25] : memref<64x128xf32, #tpu.memory_space<vmem>>, vector<8x128xf32>
      %25 = arith.addi %9, %22 : i32
      %c0_i32_26 = arith.constant 0 : i32
      %26 = arith.addi %25, %c0_i32_26 : i32
      %27 = vector.extract_strided_slice %24 {offsets = [0, 0], sizes = [1, 128], strides = [1, 1]} : vector<8x128xf32> to vector<1x128xf32>
      %28 = arith.truncf %arg16 : vector<1x128xf32> to vector<1x128xbf16>
      %cst_27 = arith.constant dense<0.000000e+00> : vector<1x128xf32>
      %29 = tpu.matmul %28, %8, %cst_27 {dimension_numbers = #tpu.dot_dimension_numbers<[1], [0], [0], [1], [0, 0, 1, 1], [], []>} : vector<1x128xbf16>, vector<128x128xbf16>, vector<1x128xf32> -> vector<1x128xf32>
      %30 = arith.addf %27, %29 : vector<1x128xf32>
      %cst_28 = arith.constant 0.699999988 : f32
      %31 = vector.broadcast %cst_28 : f32 to vector<1x128xf32>
      %32 = arith.mulf %31, %arg16 : vector<1x128xf32>
      %33 = arith.mulf %arg17, %30 : vector<1x128xf32>
      %34 = arith.addf %33, %arg18 : vector<1x128xf32>
      %35 = math.tanh %34 : vector<1x128xf32>
      %cst_29 = arith.constant 3.000000e-01 : f32
      %36 = vector.broadcast %cst_29 : f32 to vector<1x128xf32>
      %37 = arith.mulf %36, %35 : vector<1x128xf32>
      %38 = arith.addf %32, %37 : vector<1x128xf32>
      %39 = arith.mulf %38, %38 : vector<1x128xf32>
      %cst_30 = arith.constant 1.080000e+00 : f32
      %40 = vector.broadcast %cst_30 : f32 to vector<1x128xf32>
      %41 = arith.subf %40, %39 : vector<1x128xf32>
      %cst_31 = arith.constant 0.000000e+00 : f32
      %42 = vector.broadcast %cst_31 : f32 to vector<1x128xf32>
      %43 = arith.mulf %42, %38 : vector<1x128xf32>
      %44 = arith.addf %41, %43 : vector<1x128xf32>
      %45 = arith.mulf %38, %44 : vector<1x128xf32>
      %cst_32 = arith.constant 2.500000e+01 : f32
      %46 = vector.broadcast %cst_32 : f32 to vector<1x128xf32>
      %47 = arith.mulf %45, %46 : vector<1x128xf32>
      %cst_33 = arith.constant -0.000000e+00 : f32
      %48 = vector.broadcast %cst_33 : f32 to vector<1x128xf32>
      %49 = arith.addf %48, %47 : vector<1x128xf32>
      %cst_34 = arith.constant -9.99999974E-5 : f32
      %50 = vector.broadcast %cst_34 : f32 to vector<1x128xf32>
      %51 = arith.mulf %50, %49 : vector<1x128xf32>
      %cst_35 = arith.constant 9.99999974E-5 : f32
      %52 = vector.broadcast %cst_35 : f32 to vector<1x128xf32>
      %53 = arith.divf %52, %arg17 : vector<1x128xf32>
      %54 = arith.mulf %51, %30 : vector<1x128xf32>
      %55 = arith.addf %53, %54 : vector<1x128xf32>
      %c0_i32_36 = arith.constant 0 : i32
      %56 = arith.cmpi sgt, %26, %c0_i32_36 : i32
      %c64_i32_37 = arith.constant 64 : i32
      %57 = arith.cmpi slt, %26, %c64_i32_37 : i32
      %58 = arith.andi %56, %57 : i1
      %59 = arith.extui %58 : i1 to i32
      %60 = arith.sitofp %59 : i32 to f32
      %61 = vector.broadcast %60 : f32 to vector<1x128xf32>
      %62 = arith.mulf %61, %55 : vector<1x128xf32>
      %63 = arith.addf %arg17, %62 : vector<1x128xf32>
      %64 = vector.broadcast %60 : f32 to vector<1x128xf32>
      %65 = arith.mulf %64, %51 : vector<1x128xf32>
      %66 = arith.addf %arg18, %65 : vector<1x128xf32>
      %67 = arith.addi %9, %22 : i32
      %c1_i32_38 = arith.constant 1 : i32
      %68 = arith.addi %67, %c1_i32_38 : i32
      %69 = vector.extract_strided_slice %24 {offsets = [1, 0], sizes = [1, 128], strides = [1, 1]} : vector<8x128xf32> to vector<1x128xf32>
      %70 = arith.truncf %38 : vector<1x128xf32> to vector<1x128xbf16>
      %cst_39 = arith.constant dense<0.000000e+00> : vector<1x128xf32>
      %71 = tpu.matmul %70, %8, %cst_39 {dimension_numbers = #tpu.dot_dimension_numbers<[1], [0], [0], [1], [0, 0, 1, 1], [], []>} : vector<1x128xbf16>, vector<128x128xbf16>, vector<1x128xf32> -> vector<1x128xf32>
      %72 = arith.addf %69, %71 : vector<1x128xf32>
      %cst_40 = arith.constant 0.699999988 : f32
      %73 = vector.broadcast %cst_40 : f32 to vector<1x128xf32>
      %74 = arith.mulf %73, %38 : vector<1x128xf32>
      %75 = arith.mulf %63, %72 : vector<1x128xf32>
      %76 = arith.addf %75, %66 : vector<1x128xf32>
      %77 = math.tanh %76 : vector<1x128xf32>
      %cst_41 = arith.constant 3.000000e-01 : f32
      %78 = vector.broadcast %cst_41 : f32 to vector<1x128xf32>
      %79 = arith.mulf %78, %77 : vector<1x128xf32>
      %80 = arith.addf %74, %79 : vector<1x128xf32>
      %81 = arith.mulf %80, %80 : vector<1x128xf32>
      %cst_42 = arith.constant 1.080000e+00 : f32
      %82 = vector.broadcast %cst_42 : f32 to vector<1x128xf32>
      %83 = arith.subf %82, %81 : vector<1x128xf32>
      %cst_43 = arith.constant 0.000000e+00 : f32
      %84 = vector.broadcast %cst_43 : f32 to vector<1x128xf32>
      %85 = arith.mulf %84, %80 : vector<1x128xf32>
      %86 = arith.addf %83, %85 : vector<1x128xf32>
      %87 = arith.mulf %80, %86 : vector<1x128xf32>
      %cst_44 = arith.constant 2.500000e+01 : f32
      %88 = vector.broadcast %cst_44 : f32 to vector<1x128xf32>
      %89 = arith.mulf %87, %88 : vector<1x128xf32>
      %cst_45 = arith.constant -0.000000e+00 : f32
      %90 = vector.broadcast %cst_45 : f32 to vector<1x128xf32>
      %91 = arith.addf %90, %89 : vector<1x128xf32>
      %cst_46 = arith.constant -9.99999974E-5 : f32
      %92 = vector.broadcast %cst_46 : f32 to vector<1x128xf32>
      %93 = arith.mulf %92, %91 : vector<1x128xf32>
      %cst_47 = arith.constant 9.99999974E-5 : f32
      %94 = vector.broadcast %cst_47 : f32 to vector<1x128xf32>
      %95 = arith.divf %94, %63 : vector<1x128xf32>
      %96 = arith.mulf %93, %72 : vector<1x128xf32>
      %97 = arith.addf %95, %96 : vector<1x128xf32>
      %c0_i32_48 = arith.constant 0 : i32
      %98 = arith.cmpi sgt, %68, %c0_i32_48 : i32
      %c64_i32_49 = arith.constant 64 : i32
      %99 = arith.cmpi slt, %68, %c64_i32_49 : i32
      %100 = arith.andi %98, %99 : i1
      %101 = arith.extui %100 : i1 to i32
      %102 = arith.sitofp %101 : i32 to f32
      %103 = vector.broadcast %102 : f32 to vector<1x128xf32>
      %104 = arith.mulf %103, %97 : vector<1x128xf32>
      %105 = arith.addf %63, %104 : vector<1x128xf32>
      %106 = vector.broadcast %102 : f32 to vector<1x128xf32>
      %107 = arith.mulf %106, %93 : vector<1x128xf32>
      %108 = arith.addf %66, %107 : vector<1x128xf32>
      %109 = arith.addi %9, %22 : i32
      %c2_i32 = arith.constant 2 : i32
      %110 = arith.addi %109, %c2_i32 : i32
      %111 = vector.extract_strided_slice %24 {offsets = [2, 0], sizes = [1, 128], strides = [1, 1]} : vector<8x128xf32> to vector<1x128xf32>
      %112 = arith.truncf %80 : vector<1x128xf32> to vector<1x128xbf16>
      %cst_50 = arith.constant dense<0.000000e+00> : vector<1x128xf32>
      %113 = tpu.matmul %112, %8, %cst_50 {dimension_numbers = #tpu.dot_dimension_numbers<[1], [0], [0], [1], [0, 0, 1, 1], [], []>} : vector<1x128xbf16>, vector<128x128xbf16>, vector<1x128xf32> -> vector<1x128xf32>
      %114 = arith.addf %111, %113 : vector<1x128xf32>
      %cst_51 = arith.constant 0.699999988 : f32
      %115 = vector.broadcast %cst_51 : f32 to vector<1x128xf32>
      %116 = arith.mulf %115, %80 : vector<1x128xf32>
      %117 = arith.mulf %105, %114 : vector<1x128xf32>
      %118 = arith.addf %117, %108 : vector<1x128xf32>
      %119 = math.tanh %118 : vector<1x128xf32>
      %cst_52 = arith.constant 3.000000e-01 : f32
      %120 = vector.broadcast %cst_52 : f32 to vector<1x128xf32>
      %121 = arith.mulf %120, %119 : vector<1x128xf32>
      %122 = arith.addf %116, %121 : vector<1x128xf32>
      %123 = arith.mulf %122, %122 : vector<1x128xf32>
      %cst_53 = arith.constant 1.080000e+00 : f32
      %124 = vector.broadcast %cst_53 : f32 to vector<1x128xf32>
      %125 = arith.subf %124, %123 : vector<1x128xf32>
      %cst_54 = arith.constant 0.000000e+00 : f32
      %126 = vector.broadcast %cst_54 : f32 to vector<1x128xf32>
      %127 = arith.mulf %126, %122 : vector<1x128xf32>
      %128 = arith.addf %125, %127 : vector<1x128xf32>
      %129 = arith.mulf %122, %128 : vector<1x128xf32>
      %cst_55 = arith.constant 2.500000e+01 : f32
      %130 = vector.broadcast %cst_55 : f32 to vector<1x128xf32>
      %131 = arith.mulf %129, %130 : vector<1x128xf32>
      %cst_56 = arith.constant -0.000000e+00 : f32
      %132 = vector.broadcast %cst_56 : f32 to vector<1x128xf32>
      %133 = arith.addf %132, %131 : vector<1x128xf32>
      %cst_57 = arith.constant -9.99999974E-5 : f32
      %134 = vector.broadcast %cst_57 : f32 to vector<1x128xf32>
      %135 = arith.mulf %134, %133 : vector<1x128xf32>
      %cst_58 = arith.constant 9.99999974E-5 : f32
      %136 = vector.broadcast %cst_58 : f32 to vector<1x128xf32>
      %137 = arith.divf %136, %105 : vector<1x128xf32>
      %138 = arith.mulf %135, %114 : vector<1x128xf32>
      %139 = arith.addf %137, %138 : vector<1x128xf32>
      %c0_i32_59 = arith.constant 0 : i32
      %140 = arith.cmpi sgt, %110, %c0_i32_59 : i32
      %c64_i32_60 = arith.constant 64 : i32
      %141 = arith.cmpi slt, %110, %c64_i32_60 : i32
      %142 = arith.andi %140, %141 : i1
      %143 = arith.extui %142 : i1 to i32
      %144 = arith.sitofp %143 : i32 to f32
      %145 = vector.broadcast %144 : f32 to vector<1x128xf32>
      %146 = arith.mulf %145, %139 : vector<1x128xf32>
      %147 = arith.addf %105, %146 : vector<1x128xf32>
      %148 = vector.broadcast %144 : f32 to vector<1x128xf32>
      %149 = arith.mulf %148, %135 : vector<1x128xf32>
      %150 = arith.addf %108, %149 : vector<1x128xf32>
      %151 = arith.addi %9, %22 : i32
      %c3_i32 = arith.constant 3 : i32
      %152 = arith.addi %151, %c3_i32 : i32
      %153 = vector.extract_strided_slice %24 {offsets = [3, 0], sizes = [1, 128], strides = [1, 1]} : vector<8x128xf32> to vector<1x128xf32>
      %154 = arith.truncf %122 : vector<1x128xf32> to vector<1x128xbf16>
      %cst_61 = arith.constant dense<0.000000e+00> : vector<1x128xf32>
      %155 = tpu.matmul %154, %8, %cst_61 {dimension_numbers = #tpu.dot_dimension_numbers<[1], [0], [0], [1], [0, 0, 1, 1], [], []>} : vector<1x128xbf16>, vector<128x128xbf16>, vector<1x128xf32> -> vector<1x128xf32>
      %156 = arith.addf %153, %155 : vector<1x128xf32>
      %cst_62 = arith.constant 0.699999988 : f32
      %157 = vector.broadcast %cst_62 : f32 to vector<1x128xf32>
      %158 = arith.mulf %157, %122 : vector<1x128xf32>
      %159 = arith.mulf %147, %156 : vector<1x128xf32>
      %160 = arith.addf %159, %150 : vector<1x128xf32>
      %161 = math.tanh %160 : vector<1x128xf32>
      %cst_63 = arith.constant 3.000000e-01 : f32
      %162 = vector.broadcast %cst_63 : f32 to vector<1x128xf32>
      %163 = arith.mulf %162, %161 : vector<1x128xf32>
      %164 = arith.addf %158, %163 : vector<1x128xf32>
      %165 = arith.mulf %164, %164 : vector<1x128xf32>
      %cst_64 = arith.constant 1.080000e+00 : f32
      %166 = vector.broadcast %cst_64 : f32 to vector<1x128xf32>
      %167 = arith.subf %166, %165 : vector<1x128xf32>
      %cst_65 = arith.constant 0.000000e+00 : f32
      %168 = vector.broadcast %cst_65 : f32 to vector<1x128xf32>
      %169 = arith.mulf %168, %164 : vector<1x128xf32>
      %170 = arith.addf %167, %169 : vector<1x128xf32>
      %171 = arith.mulf %164, %170 : vector<1x128xf32>
      %cst_66 = arith.constant 2.500000e+01 : f32
      %172 = vector.broadcast %cst_66 : f32 to vector<1x128xf32>
      %173 = arith.mulf %171, %172 : vector<1x128xf32>
      %cst_67 = arith.constant -0.000000e+00 : f32
      %174 = vector.broadcast %cst_67 : f32 to vector<1x128xf32>
      %175 = arith.addf %174, %173 : vector<1x128xf32>
      %cst_68 = arith.constant -9.99999974E-5 : f32
      %176 = vector.broadcast %cst_68 : f32 to vector<1x128xf32>
      %177 = arith.mulf %176, %175 : vector<1x128xf32>
      %cst_69 = arith.constant 9.99999974E-5 : f32
      %178 = vector.broadcast %cst_69 : f32 to vector<1x128xf32>
      %179 = arith.divf %178, %147 : vector<1x128xf32>
      %180 = arith.mulf %177, %156 : vector<1x128xf32>
      %181 = arith.addf %179, %180 : vector<1x128xf32>
      %c0_i32_70 = arith.constant 0 : i32
      %182 = arith.cmpi sgt, %152, %c0_i32_70 : i32
      %c64_i32_71 = arith.constant 64 : i32
      %183 = arith.cmpi slt, %152, %c64_i32_71 : i32
      %184 = arith.andi %182, %183 : i1
      %185 = arith.extui %184 : i1 to i32
      %186 = arith.sitofp %185 : i32 to f32
      %187 = vector.broadcast %186 : f32 to vector<1x128xf32>
      %188 = arith.mulf %187, %181 : vector<1x128xf32>
      %189 = arith.addf %147, %188 : vector<1x128xf32>
      %190 = vector.broadcast %186 : f32 to vector<1x128xf32>
      %191 = arith.mulf %190, %177 : vector<1x128xf32>
      %192 = arith.addf %150, %191 : vector<1x128xf32>
      %193 = arith.addi %9, %22 : i32
      %c4_i32 = arith.constant 4 : i32
      %194 = arith.addi %193, %c4_i32 : i32
      %195 = vector.extract_strided_slice %24 {offsets = [4, 0], sizes = [1, 128], strides = [1, 1]} : vector<8x128xf32> to vector<1x128xf32>
      %196 = arith.truncf %164 : vector<1x128xf32> to vector<1x128xbf16>
      %cst_72 = arith.constant dense<0.000000e+00> : vector<1x128xf32>
      %197 = tpu.matmul %196, %8, %cst_72 {dimension_numbers = #tpu.dot_dimension_numbers<[1], [0], [0], [1], [0, 0, 1, 1], [], []>} : vector<1x128xbf16>, vector<128x128xbf16>, vector<1x128xf32> -> vector<1x128xf32>
      %198 = arith.addf %195, %197 : vector<1x128xf32>
      %cst_73 = arith.constant 0.699999988 : f32
      %199 = vector.broadcast %cst_73 : f32 to vector<1x128xf32>
      %200 = arith.mulf %199, %164 : vector<1x128xf32>
      %201 = arith.mulf %189, %198 : vector<1x128xf32>
      %202 = arith.addf %201, %192 : vector<1x128xf32>
      %203 = math.tanh %202 : vector<1x128xf32>
      %cst_74 = arith.constant 3.000000e-01 : f32
      %204 = vector.broadcast %cst_74 : f32 to vector<1x128xf32>
      %205 = arith.mulf %204, %203 : vector<1x128xf32>
      %206 = arith.addf %200, %205 : vector<1x128xf32>
      %207 = arith.mulf %206, %206 : vector<1x128xf32>
      %cst_75 = arith.constant 1.080000e+00 : f32
      %208 = vector.broadcast %cst_75 : f32 to vector<1x128xf32>
      %209 = arith.subf %208, %207 : vector<1x128xf32>
      %cst_76 = arith.constant 0.000000e+00 : f32
      %210 = vector.broadcast %cst_76 : f32 to vector<1x128xf32>
      %211 = arith.mulf %210, %206 : vector<1x128xf32>
      %212 = arith.addf %209, %211 : vector<1x128xf32>
      %213 = arith.mulf %206, %212 : vector<1x128xf32>
      %cst_77 = arith.constant 2.500000e+01 : f32
      %214 = vector.broadcast %cst_77 : f32 to vector<1x128xf32>
      %215 = arith.mulf %213, %214 : vector<1x128xf32>
      %cst_78 = arith.constant -0.000000e+00 : f32
      %216 = vector.broadcast %cst_78 : f32 to vector<1x128xf32>
      %217 = arith.addf %216, %215 : vector<1x128xf32>
      %cst_79 = arith.constant -9.99999974E-5 : f32
      %218 = vector.broadcast %cst_79 : f32 to vector<1x128xf32>
      %219 = arith.mulf %218, %217 : vector<1x128xf32>
      %cst_80 = arith.constant 9.99999974E-5 : f32
      %220 = vector.broadcast %cst_80 : f32 to vector<1x128xf32>
      %221 = arith.divf %220, %189 : vector<1x128xf32>
      %222 = arith.mulf %219, %198 : vector<1x128xf32>
      %223 = arith.addf %221, %222 : vector<1x128xf32>
      %c0_i32_81 = arith.constant 0 : i32
      %224 = arith.cmpi sgt, %194, %c0_i32_81 : i32
      %c64_i32_82 = arith.constant 64 : i32
      %225 = arith.cmpi slt, %194, %c64_i32_82 : i32
      %226 = arith.andi %224, %225 : i1
      %227 = arith.extui %226 : i1 to i32
      %228 = arith.sitofp %227 : i32 to f32
      %229 = vector.broadcast %228 : f32 to vector<1x128xf32>
      %230 = arith.mulf %229, %223 : vector<1x128xf32>
      %231 = arith.addf %189, %230 : vector<1x128xf32>
      %232 = vector.broadcast %228 : f32 to vector<1x128xf32>
      %233 = arith.mulf %232, %219 : vector<1x128xf32>
      %234 = arith.addf %192, %233 : vector<1x128xf32>
      %235 = arith.addi %9, %22 : i32
      %c5_i32 = arith.constant 5 : i32
      %236 = arith.addi %235, %c5_i32 : i32
      %237 = vector.extract_strided_slice %24 {offsets = [5, 0], sizes = [1, 128], strides = [1, 1]} : vector<8x128xf32> to vector<1x128xf32>
      %238 = arith.truncf %206 : vector<1x128xf32> to vector<1x128xbf16>
      %cst_83 = arith.constant dense<0.000000e+00> : vector<1x128xf32>
      %239 = tpu.matmul %238, %8, %cst_83 {dimension_numbers = #tpu.dot_dimension_numbers<[1], [0], [0], [1], [0, 0, 1, 1], [], []>} : vector<1x128xbf16>, vector<128x128xbf16>, vector<1x128xf32> -> vector<1x128xf32>
      %240 = arith.addf %237, %239 : vector<1x128xf32>
      %cst_84 = arith.constant 0.699999988 : f32
      %241 = vector.broadcast %cst_84 : f32 to vector<1x128xf32>
      %242 = arith.mulf %241, %206 : vector<1x128xf32>
      %243 = arith.mulf %231, %240 : vector<1x128xf32>
      %244 = arith.addf %243, %234 : vector<1x128xf32>
      %245 = math.tanh %244 : vector<1x128xf32>
      %cst_85 = arith.constant 3.000000e-01 : f32
      %246 = vector.broadcast %cst_85 : f32 to vector<1x128xf32>
      %247 = arith.mulf %246, %245 : vector<1x128xf32>
      %248 = arith.addf %242, %247 : vector<1x128xf32>
      %249 = arith.mulf %248, %248 : vector<1x128xf32>
      %cst_86 = arith.constant 1.080000e+00 : f32
      %250 = vector.broadcast %cst_86 : f32 to vector<1x128xf32>
      %251 = arith.subf %250, %249 : vector<1x128xf32>
      %cst_87 = arith.constant 0.000000e+00 : f32
      %252 = vector.broadcast %cst_87 : f32 to vector<1x128xf32>
      %253 = arith.mulf %252, %248 : vector<1x128xf32>
      %254 = arith.addf %251, %253 : vector<1x128xf32>
      %255 = arith.mulf %248, %254 : vector<1x128xf32>
      %cst_88 = arith.constant 2.500000e+01 : f32
      %256 = vector.broadcast %cst_88 : f32 to vector<1x128xf32>
      %257 = arith.mulf %255, %256 : vector<1x128xf32>
      %cst_89 = arith.constant -0.000000e+00 : f32
      %258 = vector.broadcast %cst_89 : f32 to vector<1x128xf32>
      %259 = arith.addf %258, %257 : vector<1x128xf32>
      %cst_90 = arith.constant -9.99999974E-5 : f32
      %260 = vector.broadcast %cst_90 : f32 to vector<1x128xf32>
      %261 = arith.mulf %260, %259 : vector<1x128xf32>
      %cst_91 = arith.constant 9.99999974E-5 : f32
      %262 = vector.broadcast %cst_91 : f32 to vector<1x128xf32>
      %263 = arith.divf %262, %231 : vector<1x128xf32>
      %264 = arith.mulf %261, %240 : vector<1x128xf32>
      %265 = arith.addf %263, %264 : vector<1x128xf32>
      %c0_i32_92 = arith.constant 0 : i32
      %266 = arith.cmpi sgt, %236, %c0_i32_92 : i32
      %c64_i32_93 = arith.constant 64 : i32
      %267 = arith.cmpi slt, %236, %c64_i32_93 : i32
      %268 = arith.andi %266, %267 : i1
      %269 = arith.extui %268 : i1 to i32
      %270 = arith.sitofp %269 : i32 to f32
      %271 = vector.broadcast %270 : f32 to vector<1x128xf32>
      %272 = arith.mulf %271, %265 : vector<1x128xf32>
      %273 = arith.addf %231, %272 : vector<1x128xf32>
      %274 = vector.broadcast %270 : f32 to vector<1x128xf32>
      %275 = arith.mulf %274, %261 : vector<1x128xf32>
      %276 = arith.addf %234, %275 : vector<1x128xf32>
      %277 = arith.addi %9, %22 : i32
      %c6_i32 = arith.constant 6 : i32
      %278 = arith.addi %277, %c6_i32 : i32
      %279 = vector.extract_strided_slice %24 {offsets = [6, 0], sizes = [1, 128], strides = [1, 1]} : vector<8x128xf32> to vector<1x128xf32>
      %280 = arith.truncf %248 : vector<1x128xf32> to vector<1x128xbf16>
      %cst_94 = arith.constant dense<0.000000e+00> : vector<1x128xf32>
      %281 = tpu.matmul %280, %8, %cst_94 {dimension_numbers = #tpu.dot_dimension_numbers<[1], [0], [0], [1], [0, 0, 1, 1], [], []>} : vector<1x128xbf16>, vector<128x128xbf16>, vector<1x128xf32> -> vector<1x128xf32>
      %282 = arith.addf %279, %281 : vector<1x128xf32>
      %cst_95 = arith.constant 0.699999988 : f32
      %283 = vector.broadcast %cst_95 : f32 to vector<1x128xf32>
      %284 = arith.mulf %283, %248 : vector<1x128xf32>
      %285 = arith.mulf %273, %282 : vector<1x128xf32>
      %286 = arith.addf %285, %276 : vector<1x128xf32>
      %287 = math.tanh %286 : vector<1x128xf32>
      %cst_96 = arith.constant 3.000000e-01 : f32
      %288 = vector.broadcast %cst_96 : f32 to vector<1x128xf32>
      %289 = arith.mulf %288, %287 : vector<1x128xf32>
      %290 = arith.addf %284, %289 : vector<1x128xf32>
      %291 = arith.mulf %290, %290 : vector<1x128xf32>
      %cst_97 = arith.constant 1.080000e+00 : f32
      %292 = vector.broadcast %cst_97 : f32 to vector<1x128xf32>
      %293 = arith.subf %292, %291 : vector<1x128xf32>
      %cst_98 = arith.constant 0.000000e+00 : f32
      %294 = vector.broadcast %cst_98 : f32 to vector<1x128xf32>
      %295 = arith.mulf %294, %290 : vector<1x128xf32>
      %296 = arith.addf %293, %295 : vector<1x128xf32>
      %297 = arith.mulf %290, %296 : vector<1x128xf32>
      %cst_99 = arith.constant 2.500000e+01 : f32
      %298 = vector.broadcast %cst_99 : f32 to vector<1x128xf32>
      %299 = arith.mulf %297, %298 : vector<1x128xf32>
      %cst_100 = arith.constant -0.000000e+00 : f32
      %300 = vector.broadcast %cst_100 : f32 to vector<1x128xf32>
      %301 = arith.addf %300, %299 : vector<1x128xf32>
      %cst_101 = arith.constant -9.99999974E-5 : f32
      %302 = vector.broadcast %cst_101 : f32 to vector<1x128xf32>
      %303 = arith.mulf %302, %301 : vector<1x128xf32>
      %cst_102 = arith.constant 9.99999974E-5 : f32
      %304 = vector.broadcast %cst_102 : f32 to vector<1x128xf32>
      %305 = arith.divf %304, %273 : vector<1x128xf32>
      %306 = arith.mulf %303, %282 : vector<1x128xf32>
      %307 = arith.addf %305, %306 : vector<1x128xf32>
      %c0_i32_103 = arith.constant 0 : i32
      %308 = arith.cmpi sgt, %278, %c0_i32_103 : i32
      %c64_i32_104 = arith.constant 64 : i32
      %309 = arith.cmpi slt, %278, %c64_i32_104 : i32
      %310 = arith.andi %308, %309 : i1
      %311 = arith.extui %310 : i1 to i32
      %312 = arith.sitofp %311 : i32 to f32
      %313 = vector.broadcast %312 : f32 to vector<1x128xf32>
      %314 = arith.mulf %313, %307 : vector<1x128xf32>
      %315 = arith.addf %273, %314 : vector<1x128xf32>
      %316 = vector.broadcast %312 : f32 to vector<1x128xf32>
      %317 = arith.mulf %316, %303 : vector<1x128xf32>
      %318 = arith.addf %276, %317 : vector<1x128xf32>
      %319 = arith.addi %9, %22 : i32
      %c7_i32 = arith.constant 7 : i32
      %320 = arith.addi %319, %c7_i32 : i32
      %321 = vector.extract_strided_slice %24 {offsets = [7, 0], sizes = [1, 128], strides = [1, 1]} : vector<8x128xf32> to vector<1x128xf32>
      %322 = arith.truncf %290 : vector<1x128xf32> to vector<1x128xbf16>
      %cst_105 = arith.constant dense<0.000000e+00> : vector<1x128xf32>
      %323 = tpu.matmul %322, %8, %cst_105 {dimension_numbers = #tpu.dot_dimension_numbers<[1], [0], [0], [1], [0, 0, 1, 1], [], []>} : vector<1x128xbf16>, vector<128x128xbf16>, vector<1x128xf32> -> vector<1x128xf32>
      %324 = arith.addf %321, %323 : vector<1x128xf32>
      %cst_106 = arith.constant 0.699999988 : f32
      %325 = vector.broadcast %cst_106 : f32 to vector<1x128xf32>
      %326 = arith.mulf %325, %290 : vector<1x128xf32>
      %327 = arith.mulf %315, %324 : vector<1x128xf32>
      %328 = arith.addf %327, %318 : vector<1x128xf32>
      %329 = math.tanh %328 : vector<1x128xf32>
      %cst_107 = arith.constant 3.000000e-01 : f32
      %330 = vector.broadcast %cst_107 : f32 to vector<1x128xf32>
      %331 = arith.mulf %330, %329 : vector<1x128xf32>
      %332 = arith.addf %326, %331 : vector<1x128xf32>
      %333 = arith.mulf %332, %332 : vector<1x128xf32>
      %cst_108 = arith.constant 1.080000e+00 : f32
      %334 = vector.broadcast %cst_108 : f32 to vector<1x128xf32>
      %335 = arith.subf %334, %333 : vector<1x128xf32>
      %cst_109 = arith.constant 0.000000e+00 : f32
      %336 = vector.broadcast %cst_109 : f32 to vector<1x128xf32>
      %337 = arith.mulf %336, %332 : vector<1x128xf32>
      %338 = arith.addf %335, %337 : vector<1x128xf32>
      %339 = arith.mulf %332, %338 : vector<1x128xf32>
      %cst_110 = arith.constant 2.500000e+01 : f32
      %340 = vector.broadcast %cst_110 : f32 to vector<1x128xf32>
      %341 = arith.mulf %339, %340 : vector<1x128xf32>
      %cst_111 = arith.constant -0.000000e+00 : f32
      %342 = vector.broadcast %cst_111 : f32 to vector<1x128xf32>
      %343 = arith.addf %342, %341 : vector<1x128xf32>
      %cst_112 = arith.constant -9.99999974E-5 : f32
      %344 = vector.broadcast %cst_112 : f32 to vector<1x128xf32>
      %345 = arith.mulf %344, %343 : vector<1x128xf32>
      %cst_113 = arith.constant 9.99999974E-5 : f32
      %346 = vector.broadcast %cst_113 : f32 to vector<1x128xf32>
      %347 = arith.divf %346, %315 : vector<1x128xf32>
      %348 = arith.mulf %345, %324 : vector<1x128xf32>
      %349 = arith.addf %347, %348 : vector<1x128xf32>
      %c0_i32_114 = arith.constant 0 : i32
      %350 = arith.cmpi sgt, %320, %c0_i32_114 : i32
      %c64_i32_115 = arith.constant 64 : i32
      %351 = arith.cmpi slt, %320, %c64_i32_115 : i32
      %352 = arith.andi %350, %351 : i1
      %353 = arith.extui %352 : i1 to i32
      %354 = arith.sitofp %353 : i32 to f32
      %355 = vector.broadcast %354 : f32 to vector<1x128xf32>
      %356 = arith.mulf %355, %349 : vector<1x128xf32>
      %357 = arith.addf %315, %356 : vector<1x128xf32>
      %358 = vector.broadcast %354 : f32 to vector<1x128xf32>
      %359 = arith.mulf %358, %345 : vector<1x128xf32>
      %360 = arith.addf %318, %359 : vector<1x128xf32>
      scf.yield %332, %357, %360 : vector<1x128xf32>, vector<1x128xf32>, vector<1x128xf32>
    }
    %c8_i32_15 = arith.constant 8 : i32
    %c0_16 = arith.constant 0 : index
    %c0_17 = arith.constant 0 : index
    %15 = vector.load %arg11[%c0_16, %c0_17] : memref<1x128xf32, #tpu.memory_space<vmem>>, vector<1x128xf32>
    tpu.vector_store %arg11[%c0_16, %c0_17], %14#0 {strides = array<i32>} : memref<1x128xf32, #tpu.memory_space<vmem>>, vector<1x128xf32>,
    %c0_18 = arith.constant 0 : index
    %c0_19 = arith.constant 0 : index
    %16 = vector.load %arg12[%c0_18, %c0_19] : memref<1x128xf32, #tpu.memory_space<vmem>>, vector<1x128xf32>
    tpu.vector_store %arg12[%c0_18, %c0_19], %14#1 {strides = array<i32>} : memref<1x128xf32, #tpu.memory_space<vmem>>, vector<1x128xf32>,
    %c0_20 = arith.constant 0 : index
    %c0_21 = arith.constant 0 : index
    %17 = vector.load %arg13[%c0_20, %c0_21] : memref<1x128xf32, #tpu.memory_space<vmem>>, vector<1x128xf32>
    tpu.vector_store %arg13[%c0_20, %c0_21], %14#2 {strides = array<i32>} : memref<1x128xf32, #tpu.memory_space<vmem>>, vector<1x128xf32>,
    %c0_i32_22 = arith.constant 0 : i32
    %18 = arith.cmpi eq, %arg0, %c0_i32_22 : i32
    %19 = arith.extui %18 : i1 to i32
    %c0_i32_23 = arith.constant 0 : i32
    %20 = arith.cmpi ne, %19, %c0_i32_23 : i32
    scf.if %20 {
      %c0_24 = arith.constant 0 : index
      %c0_25 = arith.constant 0 : index
      %21 = vector.load %arg7[%c0_24, %c0_25] : memref<1x128xf32, #tpu.memory_space<vmem>>, vector<1x128xf32>
      tpu.vector_store %arg7[%c0_24, %c0_25], %14#1 {strides = array<i32>} : memref<1x128xf32, #tpu.memory_space<vmem>>, vector<1x128xf32>,
      %c0_26 = arith.constant 0 : index
      %c0_27 = arith.constant 0 : index
      %22 = vector.load %arg8[%c0_26, %c0_27] : memref<1x128xf32, #tpu.memory_space<vmem>>, vector<1x128xf32>
      tpu.vector_store %arg8[%c0_26, %c0_27], %14#2 {strides = array<i32>} : memref<1x128xf32, #tpu.memory_space<vmem>>, vector<1x128xf32>,
      %23 = tpu.iota {dimensions = array<i32: 1>} : vector<1x128xi32>
      %c128_i32 = arith.constant 128 : i32
      %24 = vector.broadcast %c128_i32 : i32 to vector<1x128xi32>
      %25 = arith.cmpi slt, %23, %24 : vector<1x128xi32>
      %26 = arith.extui %25 : vector<1x128xi1> to vector<1x128xi32>
      %27 = arith.sitofp %26 : vector<1x128xi32> to vector<1x128xf32>
      %c0_28 = arith.constant 0 : index
      %c0_29 = arith.constant 0 : index
      %28 = vector.load %arg4[%c0_28, %c0_29] : memref<1x128xf32, #tpu.memory_space<vmem>>, vector<1x128xf32>
      %29 = arith.subf %14#1, %28 : vector<1x128xf32>
      %30 = arith.mulf %29, %27 : vector<1x128xf32>
      %c0_30 = arith.constant 0 : index
      %c0_31 = arith.constant 0 : index
      %31 = vector.load %arg5[%c0_30, %c0_31] : memref<1x128xf32, #tpu.memory_space<vmem>>, vector<1x128xf32>
      %32 = arith.subf %14#2, %31 : vector<1x128xf32>
      %33 = arith.mulf %32, %27 : vector<1x128xf32>
      %34 = arith.mulf %30, %30 : vector<1x128xf32>
      %cst_32 = arith.constant dense<0.000000e+00> : vector<1xf32>
      %35 = vector.multi_reduction <add>, %34, %cst_32 [1] : vector<1x128xf32> to vector<1xf32>
      %36 = vector.shape_cast %35 : vector<1xf32> to vector<1x1xf32>
      %c0_33 = arith.constant 0 : index
      %c0_34 = arith.constant 0 : index
      %37 = vector.load %arg9[%c0_33, %c0_34] : memref<1x1xf32, #tpu.memory_space<vmem>>, vector<1x1xf32>
      tpu.vector_store %arg9[%c0_33, %c0_34], %36 {strides = array<i32>} : memref<1x1xf32, #tpu.memory_space<vmem>>, vector<1x1xf32>,
      %38 = arith.mulf %33, %33 : vector<1x128xf32>
      %cst_35 = arith.constant dense<0.000000e+00> : vector<1xf32>
      %39 = vector.multi_reduction <add>, %38, %cst_35 [1] : vector<1x128xf32> to vector<1xf32>
      %40 = vector.shape_cast %39 : vector<1xf32> to vector<1x1xf32>
      %c0_36 = arith.constant 0 : index
      %c0_37 = arith.constant 0 : index
      %41 = vector.load %arg10[%c0_36, %c0_37] : memref<1x1xf32, #tpu.memory_space<vmem>>, vector<1x1xf32>
      tpu.vector_store %arg10[%c0_36, %c0_37], %40 {strides = array<i32>} : memref<1x1xf32, #tpu.memory_space<vmem>>, vector<1x1xf32>,
    } else {
    }
    return
  }
  func.func @transform_0(%arg0: i32) -> (i32, i32) {
    %c0_i32 = arith.constant 0 : i32
    %c0_i32_0 = arith.constant 0 : i32
    return %arg0, %c0_i32 : i32, i32
  }
  func.func @transform_1(%arg0: i32) -> (i32, i32) {
    %c0_i32 = arith.constant 0 : i32
    %c0_i32_0 = arith.constant 0 : i32
    %c0_i32_1 = arith.constant 0 : i32
    return %c0_i32, %c0_i32_0 : i32, i32
  }
  func.func @transform_2(%arg0: i32) -> (i32, i32) {
    %c0_i32 = arith.constant 0 : i32
    %c0_i32_0 = arith.constant 0 : i32
    %c0_i32_1 = arith.constant 0 : i32
    return %c0_i32, %c0_i32_0 : i32, i32
  }
  func.func @transform_3(%arg0: i32) -> (i32, i32) {
    %c0_i32 = arith.constant 0 : i32
    %c0_i32_0 = arith.constant 0 : i32
    %c0_i32_1 = arith.constant 0 : i32
    return %c0_i32, %c0_i32_0 : i32, i32
  }
  func.func @transform_4(%arg0: i32) -> (i32, i32) {
    %c0_i32 = arith.constant 0 : i32
    %c0_i32_0 = arith.constant 0 : i32
    %c0_i32_1 = arith.constant 0 : i32
    return %c0_i32, %c0_i32_0 : i32, i32
  }
  func.func @transform_5(%arg0: i32) -> (i32, i32) {
    %c0_i32 = arith.constant 0 : i32
    %c0_i32_0 = arith.constant 0 : i32
    %c0_i32_1 = arith.constant 0 : i32
    return %c0_i32, %c0_i32_0 : i32, i32
  }
  func.func @transform_6(%arg0: i32) -> (i32, i32) {
    %c0_i32 = arith.constant 0 : i32
    %c0_i32_0 = arith.constant 0 : i32
    %c0_i32_1 = arith.constant 0 : i32
    return %c0_i32, %c0_i32_0 : i32, i32
  }
  func.func @transform_7(%arg0: i32) -> (i32, i32) {
    %c0_i32 = arith.constant 0 : i32
    %c0_i32_0 = arith.constant 0 : i32
    %c0_i32_1 = arith.constant 0 : i32
    return %c0_i32, %c0_i32_0 : i32, i32
  }
  func.func @transform_8(%arg0: i32) -> (i32, i32) {
    %c0_i32 = arith.constant 0 : i32
    %c0_i32_0 = arith.constant 0 : i32
    %c0_i32_1 = arith.constant 0 : i32
    return %c0_i32, %c0_i32_0 : i32, i32
  }
  func.func @transform_9(%arg0: i32) -> (i32, i32) {
    %c0_i32 = arith.constant 0 : i32
    %c0_i32_0 = arith.constant 0 : i32
    %c0_i32_1 = arith.constant 0 : i32
    return %c0_i32, %c0_i32_0 : i32, i32
  }
}

</mosaic_0001>

<bundles_post_ra>
// kernel: fn.1
= control target key start
LH: loop header
LB: loop body
LE: loop exit
PB: predicated region body
PF: predicated region fallthrough
CT: control target
= control target key end

     0   :  { %15 = vsyncpa [#allocation7], 0  ;;  %s1980_s0 = inlined_call_operand.vmem [shape: f32[64,5], index: 0, kind: input, shape index: {}]   ;;  %s1981_s1 = inlined_call_operand.vmem [shape: f32[5,128], index: 1, kind: input, shape index: {}]   ;;  %s1982_s2 = inlined_call_operand.hbm [shape: f32[128,128], index: 2, kind: input, shape index: {}]   ;;  %s1983_s3 = inlined_call_operand.vmem [shape: f32[1,128], index: 3, kind: input, shape index: {}]   ;;  %s1984_s4 = inlined_call_operand.vmem [shape: f32[1,128], index: 4, kind: input, shape index: {}]   ;;  %s1985_s5 = inlined_call_operand.vmem [shape: f32[1,128], index: 5, kind: input, shape index: {}]   ;;  %s1986_s6 = inlined_call_operand.hbm [shape: f32[1,128], index: 6, kind: output, shape index: {0}]   ;;  %s1987_s7 = inlined_call_operand.hbm [shape: f32[1,128], index: 7, kind: output, shape index: {1}]   ;;  %s1988_s8 = inlined_call_operand.hbm [shape: f32[1,1], index: 8, kind: output, shape index: {2}]   ;;  %s1989_s9 = inlined_call_operand.hbm [shape: f32[1,1], index: 9, kind: output, shape index: {3}]  }
   0x1   :  { %16 = vsyncpa [#allocation8], 0 }
   0x2   :  { %17 = vsyncpa [#allocation11], 0 }
   0x3   :  { %18 = vsyncpa [#allocation14], 0  ;;  %s1561_s30 = smov [#allocation6]   ;;  %s1411_s13 = scalar_lea.hbm %s1982_s2, 2048 }
   0x4   :  { %s28_s10 = sshll.u32 %s1561_s30, 4  ;;  %p1412_p0 = scmp.ne.s32.totalorder %s1982_s2, %s1411_s13  ;;  %s29_s10 = int_to_ptr.vmem [resolvable:$true] %s28_s10 }
   0x5   :  { %p1415_p1 = scmp.lt.u32.totalorder %s1411_s13, %s1982_s2 }
   0x7   :  { %p1417_p2 = pnand %p1415_p1, %p1412_p0 }
   0x9   :  { %1420 = shalt.err (!%p1417_p2)
}
   0xa   :  { %s1421_s18 = scalar_lea.vmem %s29_s10, 2048  ;;  %p1426_p4 = scmp.lt.s32.totalorder %s29_s10, %s29_s10 }
   0xb   :  { %p1422_p3 = scmp.ne.s32.totalorder %s29_s10, %s1421_s18  ;;  %p1427_p5 = scmp.lt.s32.totalorder %s1421_s18, %s1421_s18 }
   0xd   :  { %p1428_p6 = por %p1427_p5, %p1426_p4 }
   0xf   :  { %p1429_p7 = pnand %p1428_p6, %p1422_p3 }
  0x11   :  { %1432 = shalt.err (!%p1429_p7)
}
  0x12   :  { %s1562_s19 = smov 128   ;;  %s1563_s20 = smov 8  }
  0x13   :  { %34 = dma.hbm_to_vmem [thread:$0]  %s1982_s2, 2048, %s29_s10, [#allocation7], %s1562_s19, %s1562_s19, %s1563_s20  }
  0x14   :  { %1537 = dma.done.wait [#allocation7], 2048  }
  0x15   :  { %1538 = vsyncadd [#allocation7], 4294965248  ;;  %v49_v0 = vld [vmem:[%s1985_s5] sm:$0x1]  ;;  %v206_v3 = vld [vmem:[#allocation6] sm:$0xff]  ;;  %vm89_vm0 = vcmask 1044480  }
  0x16   :  { %v51_v1 = vld [vmem:[%s1983_s3] sm:$0x1]  ;;  %50 = vst [vmem:[#allocation2] sm:$0x1] %v49_v0  ;;  %v207_v4 = vld [vmem:[#allocation6 + $0x8] sm:$0xff]  ;;  %v208_v5 = vld [vmem:[#allocation6 + $0x10] sm:$0xff] }
  0x17   :  { %v53_v2 = vld [vmem:[%s1984_s4] sm:$0x1]  ;;  %52 = vst [vmem:[#allocation3] sm:$0x1] %v51_v1  ;;  %v210_v7 = vld [vmem:[#allocation6 + $0x20] sm:$0xff]  ;;  %v211_v8 = vld [vmem:[#allocation6 + $0x28] sm:$0xff]  ;;  %v1642_v9 = vpack.c.bf16 %v207_v4, %v206_v3 }
  0x18   :  { %54 = vst [vmem:[#allocation4] sm:$0x1] %v53_v2  ;;  %v209_v6 = vld [vmem:[#allocation6 + $0x18] sm:$0xff]  ;;  %v212_v10 = vld [vmem:[#allocation6 + $0x30] sm:$0xff]  ;;  %v214_v12 = vld [vmem:[#allocation6 + $0x40] sm:$0xff]  ;;  %v1646_v14 = vpack.c.bf16 %v211_v8, %v210_v7  ;;  %vm64_vm1 = vcmask 39936  }
  0x19   :  { %v213_v11 = vld [vmem:[#allocation6 + $0x38] sm:$0xff]  ;;  %v1644_v13 = vpack.c.bf16 %v209_v6, %v208_v5  ;;  %v215_v15 = vld [vmem:[#allocation6 + $0x48] sm:$0xff]  ;;  %v216_v16 = vld [vmem:[#allocation6 + $0x50] sm:$0xff] }
  0x1a   :  { %v217_v17 = vld [vmem:[#allocation6 + $0x58] sm:$0xff]  ;;  %v1648_v18 = vpack.c.bf16 %v213_v11, %v212_v10  ;;  %v218_v19 = vld [vmem:[#allocation6 + $0x60] sm:$0xff]  ;;  %v219_v20 = vld [vmem:[#allocation6 + $0x68] sm:$0xff]  ;;  %v1650_v22 = vpack.c.bf16 %v215_v15, %v214_v12 }
  0x1b   :  { %v220_v21 = vld [vmem:[#allocation6 + $0x70] sm:$0xff]  ;;  %v1652_v23 = vpack.c.bf16 %v217_v17, %v216_v16  ;;  %v221_v24 = vld [vmem:[#allocation6 + $0x78] sm:$0xff]  ;;  %v1654_v25 = vpack.c.bf16 %v219_v20, %v218_v19  ;;  %v56_v30 = vld [vmem:[%s1980_s0 + $0x8] sm:$0xff] }
  0x1c   :  { %v63_v26 = vld [vmem:[%s1981_s1] sm:$0x1f]  ;;  %v1662_v28 = vpack.c.bf16 %v221_v24, %v220_v21  ;;  %v60_v31 = vld [vmem:[%s1980_s0 + $0x28] sm:$0xff]  ;;  %v57_v35 = vld [vmem:[%s1980_s0 + $0x10] sm:$0xff] }
  0x1d   :  { %v55_v27 = vld [vmem:[%s1980_s0] sm:$0xff]  ;;  %1161 = vmatprep.subr.msk.mxu0 %vm89_vm0, %v63_v26  ;;  %1335 = vmatprep.subr.msk.mxu1 %vm89_vm0, %v63_v26  ;;  %v61_v36 = vld [vmem:[%s1980_s0 + $0x30] sm:$0xff]  ;;  %v58_v37 = vld [vmem:[%s1980_s0 + $0x18] sm:$0xff] }
  0x1e   :  { %v59_v29 = vld [vmem:[%s1980_s0 + $0x20] sm:$0xff]  ;;  %1162 = vmatpush3.msk.msra.mxu0 %vm89_vm0, %v63_v26  ;;  %1336 = vmatpush3.msk.msra.mxu1 %vm89_vm0, %v63_v26  ;;  %v62_v38 = vld [vmem:[%s1980_s0 + $0x38] sm:$0xff]  ;;  %s1703_s0 = smov 0  }
  0x1f   :  { %v231_v32 = vld [vmem:[#allocation2] sm:$0x1]   ;;  %v232_v33 = vld [vmem:[#allocation3] sm:$0x1]   ;;  %v233_v34 = vld [vmem:[#allocation4] sm:$0x1]   ;;  %1163 = vmatprep.mubr.msk.f32.mxu0 %vm64_vm1, %v55_v27  ;;  %1169 = vmatprep.mubr.msk.f32.mxu1 %vm64_vm1, %v59_v29 }
  0x20   :  { %1164 = vmatmul.mubr.msk.f32.vlgmr.msra.gmra.mrb[0].mxu0 %vm64_vm1, %v56_v30  ;;  %1170 = vmatmul.mubr.msk.f32.vlgmr.msra.gmra.mrb[0].mxu1 %vm64_vm1, %v60_v31 }
  0x21   :  { %1166 = vmatprep.mubr.msk.f32.mxu0 %vm64_vm1, %v57_v35  ;;  %1172 = vmatprep.mubr.msk.f32.mxu1 %vm64_vm1, %v61_v36 }
  0x24   :  { %1167 = vmatmul.mubr.msk.f32.gmra.mrb[2].mxu0 %vm64_vm1, %v58_v37  ;;  %1173 = vmatmul.mubr.msk.f32.gmra.mrb[2].mxu1 %vm64_vm1, %v62_v38 }
  0xf3   :  { %v1165_v39 = vpop.f32.mrb[0].mxu0  ;;  %v1171_v40 = vpop.f32.mrb[0].mxu1 }
  0xf4   :  { %199 = vst [vmem:[#allocation5 + $0x8] sm:$0xff] %v1165_v39  ;;  %203 = vst [vmem:[#allocation5 + $0x28] sm:$0xff] %v1171_v40  ;;  %v159_v41 = vpop.f32.mrb[1].mxu0  ;;  %v179_v42 = vpop.f32.mrb[1].mxu1 }
  0xf5   :  { %198 = vst [vmem:[#allocation5] sm:$0xff] %v159_v41  ;;  %202 = vst [vmem:[#allocation5 + $0x20] sm:$0xff] %v179_v42 }
  0xf7   :  { %v1168_v43 = vpop.f32.mrb[2].mxu0  ;;  %v1174_v44 = vpop.f32.mrb[2].mxu1 }
  0xf8   :  { %201 = vst [vmem:[#allocation5 + $0x18] sm:$0xff] %v1168_v43  ;;  %205 = vst [vmem:[#allocation5 + $0x38] sm:$0xff] %v1174_v44  ;;  %v169_v45 = vpop.f32.mrb[3].mxu0  ;;  %v189_v46 = vpop.f32.mrb[3].mxu1 }
  0xf9   :  { %200 = vst [vmem:[#allocation5 + $0x10] sm:$0xff] %v169_v45  ;;  %204 = vst [vmem:[#allocation5 + $0x30] sm:$0xff] %v189_v46 }
  0xfa LB: > { %v1564_v47 = vmov 0.0   ;;  %vm1565_vm2 = vmmov 0   ;;  %v247_v48 = vpack.c.bf16 %v1555_v32, %v1555_v32  ;;  %s1776_s23 = sshll.u32 %s1559_s0, 3  ;;  %v289_v57 = vmul.f32 0.7, %v1555_v32  ;;  %s239_s0 = sadd.s32 1, %s1559_s0   ;;  %s1559_s0 = sphi %s1703_s0, %s239_s0   ;;  %v1555_v32 = vphi %v231_v32, %v1992_v32   ;;  %v1551_v33 = vphi %v232_v33, %v1991_v33   ;;  %v1547_v34 = vphi %v233_v34, %v1990_v34  }
  0xfb   : > { %1175 = vmatprep.subr.bf16.mxu0 %v1564_v47  ;;  %1191 = vmatprep.mubr.msk.bf16.mxu0 %vm1565_vm2, %v1564_v47  ;;  %s244_s24 = scalar_lea.vmem [#allocation5], %s1776_s23  ;;  %p306_p8 = scmp.gt.s32.totalorder %s1776_s23, 0  ;;  %v1566_v10 = vmov 1966171168   ;;  %v368_v12 = vlaneseq }
  0xfc   : > { %1176 = vmatpush3.bf16.msra.mxu0 %v1642_v9  ;;  %1195 = vmatprep.subr.bf16.mxu1 %v1564_v47  ;;  %p307_p9 = scmp.lt.s32.totalorder %s1776_s23, 64  ;;  %v366_v11 = vunpack.c.l.s4 %v1566_v10  ;;  %s317_s27 = sadd.s32 1, %s1776_s23 }
  0xfd   : > { %1177 = vmatprep.subr.bf16.mxu0 %v1564_v47  ;;  %1196 = vmatpush3.bf16.msra.mxu1 %v1642_v9  ;;  %v369_v19 = vshrl.u32 %v368_v12, 7  ;;  %p397_p11 = scmp.gt.s32.totalorder %s317_s27, 0  ;;  %p398_p12 = scmp.lt.s32.totalorder %s317_s27, 64 }
  0xfe   : > { %1197 = vmatprep.subr.bf16.mxu1 %v1564_v47  ;;  %1211 = vmatprep.mubr.msk.bf16.mxu1 %vm1565_vm2, %v1564_v47  ;;  %p308_p10 = pnand %p307_p9, %p306_p8  ;;  %v367_v17 = vunpack.c.0.s8 %v366_v11  ;;  %s408_s5 = sadd.s32 2, %s1776_s23 }
  0xff   : > { %p399_p13 = pnand %p398_p12, %p397_p11  ;;  %p488_p0 = scmp.gt.s32.totalorder %s408_s5, 0 }
 0x100   : > { %1178 = vmatpush3.bf16.msra.mxu0 %v1644_v13  ;;  %v1779_v49 = vld [vmem:[%s244_s24] sm:$0xff]  ;;  %s1072_s25 = scalar_select %p308_p10, 0, 1  ;;  %v1812_v26 = vsub.s32 %v367_v17, %v369_v19 }
 0x101   : > { %1179 = vmatprep.subr.bf16.mxu0 %v1564_v47  ;;  %1198 = vmatpush3.bf16.msra.mxu1 %v1644_v13  ;;  %s1073_s28 = scalar_select %p399_p13, 0, 1 }
 0x102   : > { %1199 = vmatprep.subr.bf16.mxu1 %v1564_v47  ;;  %s1791_s26 = scvt.s32.f32 %s1072_s25  ;;  %p489_p1 = scmp.lt.s32.totalorder %s408_s5, 64 }
 0x103   : > { %s402_s2 = scvt.s32.f32 %s1073_s28  ;;  %s499_s10 = sadd.s32 3, %s1776_s23 }
 0x104   : > { %1180 = vmatpush3.bf16.msra.mxu0 %v1646_v14  ;;  %v312_v4 = vstv %s1791_s26  ;;  %p490_p2 = pnand %p489_p1, %p488_p0  ;;  %p580_p3 = scmp.gt.s32.totalorder %s499_s10, 0 }
 0x105   : > { %1181 = vmatprep.subr.bf16.mxu0 %v1564_v47  ;;  %1200 = vmatpush3.bf16.msra.mxu1 %v1646_v14  ;;  %p581_p4 = scmp.lt.s32.totalorder %s499_s10, 64  ;;  %s591_s13 = sadd.s32 4, %s1776_s23 }
 0x106   : > { %1201 = vmatprep.subr.bf16.mxu1 %v1564_v47  ;;  %s1074_s29 = scalar_select %p490_p2, 0, 1 }
 0x107   : > { %p582_p5 = pnand %p581_p4, %p580_p3  ;;  %p671_p6 = scmp.gt.s32.totalorder %s591_s13, 0 }
 0x108   : > { %1182 = vmatpush3.bf16.msra.mxu0 %v1648_v18  ;;  %s493_s30 = scvt.s32.f32 %s1074_s29  ;;  %p672_p7 = scmp.lt.s32.totalorder %s591_s13, 64 }
 0x109   : > { %1183 = vmatprep.subr.bf16.mxu0 %v1564_v47  ;;  %1202 = vmatpush3.bf16.msra.mxu1 %v1648_v18  ;;  %s1075_s11 = scalar_select %p582_p5, 0, 1 }
 0x10a   : > { %1203 = vmatprep.subr.bf16.mxu1 %v1564_v47  ;;  %p673_p8 = pnand %p672_p7, %p671_p6  ;;  %s682_s15 = sadd.s32 5, %s1776_s23 }
 0x10b   : > { %s585_s12 = scvt.s32.f32 %s1075_s11  ;;  %p763_p9 = scmp.gt.s32.totalorder %s682_s15, 0 }
 0x10c   : > { %1184 = vmatpush3.bf16.msra.mxu0 %v1650_v22  ;;  %s1076_s1 = scalar_select %p673_p8, 0, 1 }
 0x10d   : > { %1185 = vmatprep.subr.bf16.mxu0 %v1564_v47  ;;  %1204 = vmatpush3.bf16.msra.mxu1 %v1650_v22  ;;  %p764_p10 = scmp.lt.s32.totalorder %s682_s15, 64  ;;  %s774_s18 = sadd.s32 6, %s1776_s23 }
 0x10e   : > { %1205 = vmatprep.subr.bf16.mxu1 %v1564_v47  ;;  %s676_s14 = scvt.s32.f32 %s1076_s1  ;;  %p855_p12 = scmp.gt.s32.totalorder %s774_s18, 0 }
 0x10f   : > { %p765_p11 = pnand %p764_p10, %p763_p9  ;;  %p856_p13 = scmp.lt.s32.totalorder %s774_s18, 64 }
 0x110   : > { %1186 = vmatpush3.bf16.msra.mxu0 %v1652_v23  ;;  %s866_s21 = sadd.s32 7, %s1776_s23  ;;  %p236_p4 = scmp.ge.s32.totalorder %s239_s0, 8  }
 0x111   : > { %1187 = vmatprep.subr.bf16.mxu0 %v1564_v47  ;;  %1206 = vmatpush3.bf16.msra.mxu1 %v1652_v23  ;;  %s1077_s16 = scalar_select %p765_p11, 0, 1 }
 0x112   : > { %1207 = vmatprep.subr.bf16.mxu1 %v1564_v47  ;;  %p857_p0 = pnand %p856_p13, %p855_p12  ;;  %p948_p1 = scmp.gt.s32.totalorder %s866_s21, 0  ;;  %vm979_vm3 = vcmask (%p236_p4), 1040384  }
 0x113   : > { %s768_s17 = scvt.s32.f32 %s1077_s16  ;;  %p949_p2 = scmp.lt.s32.totalorder %s866_s21, 64 }
 0x114   : > { %1188 = vmatpush3.bf16.msra.mxu0 %v1654_v25  ;;  %s1078_s19 = scalar_select %p857_p0, 0, 1 }
 0x115   : > { %1189 = vmatprep.subr.bf16.mxu0 %v1564_v47  ;;  %1208 = vmatpush3.bf16.msra.mxu1 %v1654_v25  ;;  %p950_p3 = pnand %p949_p2, %p948_p1  ;;  %s1567_s0 = smov (%p236_p4), [#allocation10]  }
 0x116   : > { %1209 = vmatprep.subr.bf16.mxu1 %v1564_v47  ;;  %s860_s20 = scvt.s32.f32 %s1078_s19  ;;  %s1568_s28 = smov (%p236_p4), [#allocation9]  }
 0x117   : > { %s1079_s22 = scalar_select %p950_p3, 0, 1 }
 0x118   : > { %1190 = vmatpush3.bf16.msra.mxu0 %v1662_v28 }
 0x119   : > { %1210 = vmatpush3.bf16.msra.mxu1 %v1662_v28  ;;  %1215 = vmatprep.subr.bf16.mxu0 %v1564_v47  ;;  %s953_s24 = scvt.s32.f32 %s1079_s22 }
 0x11a   : > { %1235 = vmatprep.subr.bf16.mxu1 %v1564_v47 }
 0x11b   : > { %1192 = vmatmul.mubr.bf16.vlgmr.msra.gmra.mrb[0].mxu0 %v247_v48 }
 0x11c   : > { %1216 = vmatpush3.bf16.msra.mxu0 %v1642_v9  ;;  %1231 = vmatprep.mubr.msk.bf16.mxu0 %vm1565_vm2, %v1564_v47 }
 0x11d   : > { %1217 = vmatprep.subr.bf16.mxu0 %v1564_v47 }
 0x120   : > { %1218 = vmatpush3.bf16.msra.mxu0 %v1644_v13 }
 0x121   : > { %1219 = vmatprep.subr.bf16.mxu0 %v1564_v47 }
 0x124   : > { %1220 = vmatpush3.bf16.msra.mxu0 %v1646_v14 }
 0x125   : > { %1221 = vmatprep.subr.bf16.mxu0 %v1564_v47 }
 0x128   : > { %1222 = vmatpush3.bf16.msra.mxu0 %v1648_v18 }
 0x129   : > { %1223 = vmatprep.subr.bf16.mxu0 %v1564_v47 }
 0x12c   : > { %1224 = vmatpush3.bf16.msra.mxu0 %v1650_v22 }
 0x12d   : > { %1225 = vmatprep.subr.bf16.mxu0 %v1564_v47 }
 0x130   : > { %1226 = vmatpush3.bf16.msra.mxu0 %v1652_v23 }
 0x131   : > { %1227 = vmatprep.subr.bf16.mxu0 %v1564_v47 }
 0x134   : > { %1228 = vmatpush3.bf16.msra.mxu0 %v1654_v25 }
 0x135   : > { %1229 = vmatprep.subr.bf16.mxu0 %v1564_v47 }
 0x138   : > { %1230 = vmatpush3.bf16.msra.mxu0 %v1662_v28 }
 0x139   : > { %1255 = vmatprep.subr.bf16.mxu0 %v1564_v47 }
 0x1ee   : > { %v282_v50 = vpop.f32.mrb[0].mxu0 }
 0x1ef   : > { %v288_v51 = vadd.f32 %v282_v50, %v1779_v49  ;;  %v1193_v52 = vpop.f32.mrb[1].mxu0 }
 0x1f0   : > { %v285_v53 = vpop.f32.mrb[2].mxu0  ;;  %v403_v52 = vstv %s402_s2  ;;  %s996_s2 = sshll.u32 (%p236_p4), %s1568_s28, 4  ;;  %s997_s2 = int_to_ptr.vmem [resolvable:$true] %s996_s2 }
 0x1f1   : > { %v290_v54 = vmul.f32 %v1551_v33, %v288_v51  ;;  %v1194_v55 = vpop.f32.mrb[3].mxu0 }
 0x1f3   : > { %v291_v56 = vadd.f32 %v1547_v34, %v290_v54 }
 0x1f5   : > { %1379 = vtanh.f32 %v291_v56 }
 0x1f6   : > { %1381 = vrcp.f32 %v1551_v33 }
 0x1ff   : > { %v1380_v58 = vpop.eup %1379 }
 0x200   : > { %v293_v59 = vmul.f32 0.3, %v1380_v58  ;;  %v1382_v15 = vpop.eup %1381 }
 0x201   : > { %v303_v16 = vmul.f32 0.0001, %v1382_v15 }
 0x202   : > { %v294_v60 = vadd.f32 %v293_v59, %v289_v57 }
 0x204   : > { %v295_v61 = vmul.f32 %v294_v60, %v294_v60  ;;  %v318_v62 = vpack.c.bf16 %v294_v60, %v294_v60  ;;  %v297_v0 = vmul.f32 0.0, %v294_v60  ;;  %v363_v41 = vmul.f32 0.7, %v294_v60 }
 0x206   : > { %v296_v63 = vsub.f32 1.08, %v295_v61  ;;  %1212 = vmatmul.mubr.bf16.vlgmr.msra.gmra.mrb[0].mxu1 %v318_v62 }
 0x207   : > { %1236 = vmatpush3.bf16.msra.mxu1 %v1642_v9  ;;  %1251 = vmatprep.mubr.msk.bf16.mxu1 %vm1565_vm2, %v1564_v47 }
 0x208   : > { %v298_v1 = vadd.f32 %v297_v0, %v296_v63  ;;  %1237 = vmatprep.subr.bf16.mxu1 %v1564_v47 }
 0x20a   : > { %v299_v2 = vmul.f32 %v298_v1, %v294_v60 }
 0x20b   : > { %1238 = vmatpush3.bf16.msra.mxu1 %v1644_v13 }
 0x20c   : > { %v300_v3 = vmul.f32 25.0, %v299_v2  ;;  %1239 = vmatprep.subr.bf16.mxu1 %v1564_v47 }
 0x20e   : > { %v301_v5 = vmul.f32 -0.0001, %v300_v3 }
 0x20f   : > { %1240 = vmatpush3.bf16.msra.mxu1 %v1646_v14 }
 0x210   : > { %v304_v6 = vmul.f32 %v301_v5, %v288_v51  ;;  %v315_v7 = vmul.f32 %v312_v4, %v301_v5  ;;  %1241 = vmatprep.subr.bf16.mxu1 %v1564_v47 }
 0x212   : > { %v1799_v8 = vadd.f32 %v1547_v34, %v315_v7  ;;  %v305_v21 = vadd.f32 %v304_v6, %v303_v16 }
 0x213   : > { %1242 = vmatpush3.bf16.msra.mxu1 %v1648_v18 }
 0x214   : > { %1243 = vmatprep.subr.bf16.mxu1 %v1564_v47  ;;  %v313_v32 = vmul.f32 %v312_v4, %v305_v21 }
 0x216   : > { %v314_v36 = vadd.f32 %v1551_v33, %v313_v32 }
 0x217   : > { %1244 = vmatpush3.bf16.msra.mxu1 %v1650_v22 }
 0x218   : > { %1245 = vmatprep.subr.bf16.mxu1 %v1564_v47 }
 0x21b   : > { %1246 = vmatpush3.bf16.msra.mxu1 %v1652_v23 }
 0x21c   : > { %1247 = vmatprep.subr.bf16.mxu1 %v1564_v47 }
 0x21f   : > { %1248 = vmatpush3.bf16.msra.mxu1 %v1654_v25 }
 0x220   : > { %1249 = vmatprep.subr.bf16.mxu1 %v1564_v47 }
 0x223   : > { %1250 = vmatpush3.bf16.msra.mxu1 %v1662_v28 }
 0x224   : > { %1275 = vmatprep.subr.bf16.mxu1 %v1564_v47 }
 0x2d9   : > { %v353_v20 = vpop.f32.mrb[0].mxu1 }
 0x2da   : > { %v360_v24 = vrot.slane %v353_v20, 7  ;;  %v1213_v27 = vpop.f32.mrb[1].mxu1 }
 0x2db   : > { %v356_v29 = vpop.f32.mrb[2].mxu1 }
 0x2dc   : > { %v362_v30 = vadd.f32 %v360_v24, %v1779_v49  ;;  %v1214_v31 = vpop.f32.mrb[3].mxu1  ;;  %v494_v29 = vstv %s493_s30 }
 0x2de   : > { %v371_v34 = vrot.slane %v362_v30, %v1812_v26 }
 0x2e0   : > { %v372_v35 = vcombine.high %v371_v34, %v371_v34 }
 0x2e2   : > { %v379_v37 = vrot.slane %v372_v35, %v1812_v26 }
 0x2e4   : > { %v381_v38 = vmul.f32 %v379_v37, %v314_v36 }
 0x2e6   : > { %v382_v39 = vadd.f32 %v381_v38, %v1799_v8 }
 0x2e8   : > { %1383 = vtanh.f32 %v382_v39 }
 0x2e9   : > { %1385 = vrcp.f32 %v314_v36 }
 0x2f2   : > { %v1384_v40 = vpop.eup %1383 }
 0x2f3   : > { %v384_v42 = vmul.f32 0.3, %v1384_v40  ;;  %v1386_v57 = vpop.eup %1385 }
 0x2f4   : > { %v394_v58 = vmul.f32 0.0001, %v1386_v57 }
 0x2f5   : > { %v385_v43 = vadd.f32 %v384_v42, %v363_v41 }
 0x2f7   : > { %v386_v44 = vmul.f32 %v385_v43, %v385_v43  ;;  %v409_v45 = vpack.c.bf16 %v385_v43, %v385_v43  ;;  %v388_v48 = vmul.f32 0.0, %v385_v43  ;;  %v454_v11 = vmul.f32 0.7, %v385_v43 }
 0x2f9   : > { %v387_v46 = vsub.f32 1.08, %v386_v44  ;;  %1232 = vmatmul.mubr.bf16.vlgmr.msra.gmra.mrb[4].mxu0 %v409_v45 }
 0x2fa   : > { %1256 = vmatpush3.bf16.msra.mxu0 %v1642_v9  ;;  %1271 = vmatprep.mubr.msk.bf16.mxu0 %vm1565_vm2, %v1564_v47 }
 0x2fb   : > { %v389_v33 = vadd.f32 %v388_v48, %v387_v46  ;;  %1257 = vmatprep.subr.bf16.mxu0 %v1564_v47 }
 0x2fd   : > { %v390_v50 = vmul.f32 %v389_v33, %v385_v43 }
 0x2fe   : > { %1258 = vmatpush3.bf16.msra.mxu0 %v1644_v13 }
 0x2ff   : > { %v391_v51 = vmul.f32 25.0, %v390_v50  ;;  %1259 = vmatprep.subr.bf16.mxu0 %v1564_v47 }
 0x301   : > { %v392_v53 = vmul.f32 -0.0001, %v391_v51 }
 0x302   : > { %1260 = vmatpush3.bf16.msra.mxu0 %v1646_v14 }
 0x303   : > { %v395_v54 = vmul.f32 %v392_v53, %v379_v37  ;;  %v406_v55 = vmul.f32 %v403_v52, %v392_v53  ;;  %1261 = vmatprep.subr.bf16.mxu0 %v1564_v47 }
 0x305   : > { %v407_v56 = vadd.f32 %v406_v55, %v1799_v8  ;;  %v396_v60 = vadd.f32 %v395_v54, %v394_v58 }
 0x306   : > { %1262 = vmatpush3.bf16.msra.mxu0 %v1648_v18 }
 0x307   : > { %1263 = vmatprep.subr.bf16.mxu0 %v1564_v47  ;;  %v404_v2 = vmul.f32 %v403_v52, %v396_v60 }
 0x309   : > { %v405_v5 = vadd.f32 %v404_v2, %v314_v36 }
 0x30a   : > { %1264 = vmatpush3.bf16.msra.mxu0 %v1650_v22 }
 0x30b   : > { %1265 = vmatprep.subr.bf16.mxu0 %v1564_v47 }
 0x30e   : > { %1266 = vmatpush3.bf16.msra.mxu0 %v1652_v23 }
 0x30f   : > { %1267 = vmatprep.subr.bf16.mxu0 %v1564_v47 }
 0x312   : > { %1268 = vmatpush3.bf16.msra.mxu0 %v1654_v25 }
 0x313   : > { %1269 = vmatprep.subr.bf16.mxu0 %v1564_v47 }
 0x316   : > { %1270 = vmatpush3.bf16.msra.mxu0 %v1662_v28 }
 0x317   : > { %1295 = vmatprep.subr.bf16.mxu0 %v1564_v47 }
 0x3cc   : > { %v444_v59 = vpop.f32.mrb[4].mxu0 }
 0x3cd   : > { %v451_v61 = vrot.slane %v444_v59, 6  ;;  %v1233_v62 = vpop.f32.mrb[5].mxu0 }
 0x3ce   : > { %v447_v63 = vpop.f32.mrb[6].mxu0 }
 0x3cf   : > { %v453_v0 = vadd.f32 %v451_v61, %v1779_v49  ;;  %v1234_v1 = vpop.f32.mrb[7].mxu0 }
 0x3d1   : > { %v462_v3 = vrot.slane %v453_v0, %v1812_v26  ;;  %v586_v0 = vstv %s585_s12 }
 0x3d3   : > { %v469_v4 = vrot.slane %v462_v3, %v1812_v26 }
 0x3d5   : > { %v470_v6 = vcombine.high %v469_v4, %v469_v4 }
 0x3d7   : > { %v472_v7 = vmul.f32 %v470_v6, %v405_v5 }
 0x3d9   : > { %v473_v8 = vadd.f32 %v472_v7, %v407_v56 }
 0x3db   : > { %1387 = vtanh.f32 %v473_v8 }
 0x3dc   : > { %1389 = vrcp.f32 %v405_v5 }
 0x3e5   : > { %v1388_v10 = vpop.eup %1387 }
 0x3e6   : > { %v475_v12 = vmul.f32 0.3, %v1388_v10  ;;  %v1390_v35 = vpop.eup %1389 }
 0x3e7   : > { %v485_v37 = vmul.f32 0.0001, %v1390_v35 }
 0x3e8   : > { %v476_v15 = vadd.f32 %v475_v12, %v454_v11 }
 0x3ea   : > { %v477_v16 = vmul.f32 %v476_v15, %v476_v15  ;;  %v500_v17 = vpack.c.bf16 %v476_v15, %v476_v15  ;;  %v479_v20 = vmul.f32 0.0, %v476_v15  ;;  %v545_v54 = vmul.f32 0.7, %v476_v15 }
 0x3ec   : > { %v478_v19 = vsub.f32 1.08, %v477_v16  ;;  %1252 = vmatmul.mubr.bf16.vlgmr.msra.gmra.mrb[4].mxu1 %v500_v17 }
 0x3ed   : > { %1276 = vmatpush3.bf16.msra.mxu1 %v1642_v9  ;;  %1291 = vmatprep.mubr.msk.bf16.mxu1 %vm1565_vm2, %v1564_v47 }
 0x3ee   : > { %v480_v21 = vadd.f32 %v479_v20, %v478_v19  ;;  %1277 = vmatprep.subr.bf16.mxu1 %v1564_v47 }
 0x3f0   : > { %v481_v24 = vmul.f32 %v480_v21, %v476_v15 }
 0x3f1   : > { %1278 = vmatpush3.bf16.msra.mxu1 %v1644_v13 }
 0x3f2   : > { %v482_v27 = vmul.f32 25.0, %v481_v24  ;;  %1279 = vmatprep.subr.bf16.mxu1 %v1564_v47 }
 0x3f4   : > { %v483_v30 = vmul.f32 -0.0001, %v482_v27 }
 0x3f5   : > { %1280 = vmatpush3.bf16.msra.mxu1 %v1646_v14 }
 0x3f6   : > { %v486_v31 = vmul.f32 %v483_v30, %v470_v6  ;;  %v497_v32 = vmul.f32 %v494_v29, %v483_v30  ;;  %1281 = vmatprep.subr.bf16.mxu1 %v1564_v47 }
 0x3f8   : > { %v498_v34 = vadd.f32 %v497_v32, %v407_v56  ;;  %v487_v41 = vadd.f32 %v486_v31, %v485_v37 }
 0x3f9   : > { %1282 = vmatpush3.bf16.msra.mxu1 %v1648_v18 }
 0x3fa   : > { %1283 = vmatprep.subr.bf16.mxu1 %v1564_v47  ;;  %v495_v45 = vmul.f32 %v494_v29, %v487_v41 }
 0x3fc   : > { %v496_v33 = vadd.f32 %v495_v45, %v405_v5 }
 0x3fd   : > { %1284 = vmatpush3.bf16.msra.mxu1 %v1650_v22 }
 0x3fe   : > { %1285 = vmatprep.subr.bf16.mxu1 %v1564_v47 }
 0x401   : > { %1286 = vmatpush3.bf16.msra.mxu1 %v1652_v23 }
 0x402   : > { %1287 = vmatprep.subr.bf16.mxu1 %v1564_v47 }
 0x405   : > { %1288 = vmatpush3.bf16.msra.mxu1 %v1654_v25 }
 0x406   : > { %1289 = vmatprep.subr.bf16.mxu1 %v1564_v47 }
 0x409   : > { %1290 = vmatpush3.bf16.msra.mxu1 %v1662_v28 }
 0x40a   : > { %1315 = vmatprep.subr.bf16.mxu1 %v1564_v47 }
 0x4bf   : > { %v535_v36 = vpop.f32.mrb[4].mxu1 }
 0x4c0   : > { %v542_v38 = vrot.slane %v535_v36, 5  ;;  %v1253_v39 = vpop.f32.mrb[5].mxu1 }
 0x4c1   : > { %v538_v40 = vpop.f32.mrb[6].mxu1 }
 0x4c2   : > { %v544_v42 = vadd.f32 %v542_v38, %v1779_v49  ;;  %v1254_v43 = vpop.f32.mrb[7].mxu1 }
 0x4c4   : > { %v553_v44 = vrot.slane %v544_v42, %v1812_v26  ;;  %v677_v42 = vstv %s676_s14 }
 0x4c6   : > { %v554_v46 = vcombine.high %v553_v44, %v553_v44 }
 0x4c8   : > { %v561_v48 = vrot.slane %v554_v46, %v1812_v26 }
 0x4ca   : > { %v562_v50 = vcombine.high %v561_v48, %v561_v48 }
 0x4cc   : > { %v564_v51 = vmul.f32 %v562_v50, %v496_v33 }
 0x4ce   : > { %v565_v52 = vadd.f32 %v564_v51, %v498_v34 }
 0x4d0   : > { %1391 = vtanh.f32 %v565_v52 }
 0x4d1   : > { %1393 = vrcp.f32 %v496_v33 }
 0x4da   : > { %v1392_v53 = vpop.eup %1391 }
 0x4db   : > { %v567_v55 = vmul.f32 0.3, %v1392_v53  ;;  %v1394_v5 = vpop.eup %1393 }
 0x4dc   : > { %v577_v6 = vmul.f32 0.0001, %v1394_v5 }
 0x4dd   : > { %v568_v56 = vadd.f32 %v567_v55, %v545_v54 }
 0x4df   : > { %v569_v57 = vmul.f32 %v568_v56, %v568_v56  ;;  %v592_v58 = vpack.c.bf16 %v568_v56, %v568_v56  ;;  %v571_v60 = vmul.f32 0.0, %v568_v56  ;;  %v637_v31 = vmul.f32 0.7, %v568_v56 }
 0x4e1   : > { %v570_v59 = vsub.f32 1.08, %v569_v57  ;;  %1272 = vmatmul.mubr.bf16.vlgmr.msra.gmra.mrb[8].mxu0 %v592_v58 }
 0x4e2   : > { %1296 = vmatpush3.bf16.msra.mxu0 %v1642_v9  ;;  %1311 = vmatprep.mubr.msk.bf16.mxu0 %vm1565_vm2, %v1564_v47 }
 0x4e3   : > { %v572_v61 = vadd.f32 %v571_v60, %v570_v59  ;;  %1297 = vmatprep.subr.bf16.mxu0 %v1564_v47 }
 0x4e5   : > { %v573_v62 = vmul.f32 %v572_v61, %v568_v56 }
 0x4e6   : > { %1298 = vmatpush3.bf16.msra.mxu0 %v1644_v13 }
 0x4e7   : > { %v574_v63 = vmul.f32 25.0, %v573_v62  ;;  %1299 = vmatprep.subr.bf16.mxu0 %v1564_v47 }
 0x4e9   : > { %v575_v1 = vmul.f32 -0.0001, %v574_v63 }
 0x4ea   : > { %1300 = vmatpush3.bf16.msra.mxu0 %v1646_v14 }
 0x4eb   : > { %v578_v2 = vmul.f32 %v575_v1, %v562_v50  ;;  %v589_v3 = vmul.f32 %v586_v0, %v575_v1  ;;  %1301 = vmatprep.subr.bf16.mxu0 %v1564_v47 }
 0x4ed   : > { %v590_v4 = vadd.f32 %v589_v3, %v498_v34  ;;  %v579_v8 = vadd.f32 %v578_v2, %v577_v6 }
 0x4ee   : > { %1302 = vmatpush3.bf16.msra.mxu0 %v1648_v18 }
 0x4ef   : > { %1303 = vmatprep.subr.bf16.mxu0 %v1564_v47  ;;  %v587_v17 = vmul.f32 %v586_v0, %v579_v8 }
 0x4f1   : > { %v588_v21 = vadd.f32 %v587_v17, %v496_v33 }
 0x4f2   : > { %1304 = vmatpush3.bf16.msra.mxu0 %v1650_v22 }
 0x4f3   : > { %1305 = vmatprep.subr.bf16.mxu0 %v1564_v47 }
 0x4f6   : > { %1306 = vmatpush3.bf16.msra.mxu0 %v1652_v23 }
 0x4f7   : > { %1307 = vmatprep.subr.bf16.mxu0 %v1564_v47 }
 0x4fa   : > { %1308 = vmatpush3.bf16.msra.mxu0 %v1654_v25 }
 0x4fb   : > { %1309 = vmatprep.subr.bf16.mxu0 %v1564_v47 }
 0x4fe   : > { %1310 = vmatpush3.bf16.msra.mxu0 %v1662_v28 }
 0x5b4   : > { %v627_v7 = vpop.f32.mrb[8].mxu0 }
 0x5b5   : > { %v634_v10 = vrot.slane %v627_v7, 4  ;;  %v1273_v11 = vpop.f32.mrb[9].mxu0 }
 0x5b6   : > { %v630_v12 = vpop.f32.mrb[10].mxu0 }
 0x5b7   : > { %v636_v15 = vadd.f32 %v634_v10, %v1779_v49  ;;  %v1274_v16 = vpop.f32.mrb[11].mxu0  ;;  %v769_v12 = vstv %s768_s17 }
 0x5b9   : > { %v639_v19 = vcombine.high %v636_v15, %v636_v15 }
 0x5bb   : > { %v646_v20 = vrot.slane %v639_v19, %v1812_v26 }
 0x5bd   : > { %v653_v24 = vrot.slane %v646_v20, %v1812_v26 }
 0x5bf   : > { %v655_v27 = vmul.f32 %v653_v24, %v588_v21 }
 0x5c1   : > { %v656_v29 = vadd.f32 %v655_v27, %v590_v4 }
 0x5c3   : > { %1395 = vtanh.f32 %v656_v29 }
 0x5c4   : > { %1397 = vrcp.f32 %v588_v21 }
 0x5cd   : > { %v1396_v30 = vpop.eup %1395 }
 0x5ce   : > { %v658_v32 = vmul.f32 0.3, %v1396_v30  ;;  %v1398_v48 = vpop.eup %1397 }
 0x5cf   : > { %v668_v50 = vmul.f32 0.0001, %v1398_v48 }
 0x5d0   : > { %v659_v34 = vadd.f32 %v658_v32, %v637_v31 }
 0x5d2   : > { %v660_v35 = vmul.f32 %v659_v34, %v659_v34  ;;  %v683_v36 = vpack.c.bf16 %v659_v34, %v659_v34  ;;  %v662_v38 = vmul.f32 0.0, %v659_v34  ;;  %v728_v1 = vmul.f32 0.7, %v659_v34 }
 0x5d4   : > { %v661_v37 = vsub.f32 1.08, %v660_v35  ;;  %1292 = vmatmul.mubr.bf16.vlgmr.msra.gmra.mrb[8].mxu1 %v683_v36 }
 0x5d5   : > { %1316 = vmatpush3.bf16.msra.mxu1 %v1642_v9  ;;  %1331 = vmatprep.mubr.msk.bf16.mxu1 %vm1565_vm2, %v1564_v47 }
 0x5d6   : > { %v663_v39 = vadd.f32 %v662_v38, %v661_v37  ;;  %1317 = vmatprep.subr.bf16.mxu1 %v1564_v47 }
 0x5d8   : > { %v664_v40 = vmul.f32 %v663_v39, %v659_v34 }
 0x5d9   : > { %1318 = vmatpush3.bf16.msra.mxu1 %v1644_v13 }
 0x5da   : > { %v665_v41 = vmul.f32 25.0, %v664_v40  ;;  %1319 = vmatprep.subr.bf16.mxu1 %v1564_v47 }
 0x5dc   : > { %v666_v43 = vmul.f32 -0.0001, %v665_v41 }
 0x5dd   : > { %1320 = vmatpush3.bf16.msra.mxu1 %v1646_v14 }
 0x5de   : > { %v669_v44 = vmul.f32 %v666_v43, %v653_v24  ;;  %v680_v45 = vmul.f32 %v677_v42, %v666_v43  ;;  %1321 = vmatprep.subr.bf16.mxu1 %v1564_v47 }
 0x5e0   : > { %v681_v46 = vadd.f32 %v680_v45, %v590_v4  ;;  %v670_v54 = vadd.f32 %v669_v44, %v668_v50 }
 0x5e1   : > { %1322 = vmatpush3.bf16.msra.mxu1 %v1648_v18 }
 0x5e2   : > { %1323 = vmatprep.subr.bf16.mxu1 %v1564_v47  ;;  %v678_v58 = vmul.f32 %v677_v42, %v670_v54 }
 0x5e5   : > { %1324 = vmatpush3.bf16.msra.mxu1 %v1650_v22 }
 0x5e6   : > { %1325 = vmatprep.subr.bf16.mxu1 %v1564_v47 }
 0x5e9   : > { %1326 = vmatpush3.bf16.msra.mxu1 %v1652_v23 }
 0x5ea   : > { %1327 = vmatprep.subr.bf16.mxu1 %v1564_v47 }
 0x5ed   : > { %1328 = vmatpush3.bf16.msra.mxu1 %v1654_v25 }
 0x5ee   : > { %1329 = vmatprep.subr.bf16.mxu1 %v1564_v47  ;;  %v679_v47 = vadd.f32 %v678_v58, %v588_v21 }
 0x5f1   : > { %1330 = vmatpush3.bf16.msra.mxu1 %v1662_v28 }
 0x6a7   : > { %v718_v33 = vpop.f32.mrb[8].mxu1 }
 0x6a8   : > { %v725_v51 = vrot.slane %v718_v33, 3  ;;  %v1293_v52 = vpop.f32.mrb[9].mxu1 }
 0x6a9   : > { %v721_v53 = vpop.f32.mrb[10].mxu1 }
 0x6aa   : > { %v727_v55 = vadd.f32 %v725_v51, %v1779_v49  ;;  %v1294_v56 = vpop.f32.mrb[11].mxu1 }
 0x6ac   : > { %v730_v57 = vcombine.high %v727_v55, %v727_v55  ;;  %v861_v55 = vstv %s860_s20 }
 0x6ae   : > { %v737_v59 = vrot.slane %v730_v57, %v1812_v26 }
 0x6b0   : > { %v738_v60 = vcombine.high %v737_v59, %v737_v59 }
 0x6b2   : > { %v745_v61 = vrot.slane %v738_v60, %v1812_v26 }
 0x6b4   : > { %v747_v62 = vmul.f32 %v745_v61, %v679_v47 }
 0x6b6   : > { %v748_v63 = vadd.f32 %v747_v62, %v681_v46 }
 0x6b8   : > { %1399 = vtanh.f32 %v748_v63 }
 0x6b9   : > { %1401 = vrcp.f32 %v679_v47 }
 0x6c2   : > { %v1400_v0 = vpop.eup %1399 }
 0x6c3   : > { %v750_v2 = vmul.f32 0.3, %v1400_v0  ;;  %v1402_v20 = vpop.eup %1401 }
 0x6c4   : > { %v760_v24 = vmul.f32 0.0001, %v1402_v20 }
 0x6c5   : > { %v751_v3 = vadd.f32 %v750_v2, %v728_v1 }
 0x6c7   : > { %v752_v4 = vmul.f32 %v751_v3, %v751_v3  ;;  %v775_v5 = vpack.c.bf16 %v751_v3, %v751_v3  ;;  %v754_v7 = vmul.f32 0.0, %v751_v3  ;;  %v820_v44 = vmul.f32 0.7, %v751_v3 }
 0x6c9   : > { %v753_v6 = vsub.f32 1.08, %v752_v4  ;;  %1312 = vmatmul.mubr.bf16.vlgmr.msra.gmra.mrb[12].mxu0 %v775_v5 }
 0x6cb   : > { %v755_v8 = vadd.f32 %v754_v7, %v753_v6 }
 0x6cd   : > { %v756_v10 = vmul.f32 %v755_v8, %v751_v3 }
 0x6cf   : > { %v757_v11 = vmul.f32 25.0, %v756_v10 }
 0x6d1   : > { %v758_v15 = vmul.f32 -0.0001, %v757_v11 }
 0x6d3   : > { %v761_v16 = vmul.f32 %v758_v15, %v745_v61  ;;  %v772_v17 = vmul.f32 %v769_v12, %v758_v15 }
 0x6d5   : > { %v773_v19 = vadd.f32 %v772_v17, %v681_v46  ;;  %v762_v31 = vadd.f32 %v761_v16, %v760_v24 }
 0x6d7   : > { %v770_v36 = vmul.f32 %v769_v12, %v762_v31  ;;  %v954_v31 = vstv %s953_s24 }
 0x6d9   : > { %v771_v39 = vadd.f32 %v770_v36, %v679_v47 }
 0x79c   : > { %v810_v21 = vpop.f32.mrb[12].mxu0 }
 0x79d   : > { %v817_v27 = vrot.slane %v810_v21, 2  ;;  %v1313_v29 = vpop.f32.mrb[13].mxu0 }
 0x79e   : > { %v813_v30 = vpop.f32.mrb[14].mxu0 }
 0x79f   : > { %v819_v32 = vadd.f32 %v817_v27, %v1779_v49  ;;  %v1314_v34 = vpop.f32.mrb[15].mxu0 }
 0x7a1   : > { %v822_v35 = vcombine.high %v819_v32, %v819_v32 }
 0x7a3   : > { %v829_v37 = vrot.slane %v822_v35, %v1812_v26 }
 0x7a5   : > { %v836_v38 = vrot.slane %v829_v37, %v1812_v26 }
 0x7a7   : > { %v837_v40 = vcombine.high %v836_v38, %v836_v38 }
 0x7a9   : > { %v839_v41 = vmul.f32 %v837_v40, %v771_v39 }
 0x7ab   : > { %v840_v42 = vadd.f32 %v839_v41, %v773_v19  ;;  %v972_v41 = vld [vmem:[%s1983_s3] sm:$0x1] (%p236_p4)  ;;  %s1006_s3 = sshll.u32 (%p236_p4), %s1567_s0, 4  ;;  %s1007_s3 = int_to_ptr.vmem [resolvable:$true] %s1006_s3 }
 0x7ac   :  { %s1437_s5 = scalar_lea.vmem (%p236_p4), %s1007_s3, 32  ;;  %p1438_p6 = scmp.lt.s32.totalorder (%p236_p4), %s1007_s3, %s1007_s3 }
 0x7ad   : > { %1403 = vtanh.f32 %v840_v42  ;;  %v975_v42 = vld [vmem:[%s1984_s4] sm:$0x1] (%p236_p4)  ;;  %s1433_s4 = scalar_lea.vmem (%p236_p4), %s1007_s3, 16 }
 0x7ae   : > { %1405 = vrcp.f32 %v771_v39  ;;  %p1434_p5 = scmp.ne.s32.totalorder (%p236_p4), %s1007_s3, %s1433_s4  ;;  %p1439_p7 = scmp.lt.s32.totalorder (%p236_p4), %s1437_s5, %s1433_s4 }
 0x7b0   :  { %p1440_p8 = por (%p236_p4), %p1439_p7, %p1438_p6 }
 0x7b2   :  { %p1441_p9 = pnand (%p236_p4), %p1440_p8, %p1434_p5 }
 0x7b7   : > { %v1404_v43 = vpop.eup %1403 }
 0x7b8   : > { %v842_v45 = vmul.f32 0.3, %v1404_v43  ;;  %v1406_v60 = vpop.eup %1405 }
 0x7b9   : > { %v852_v0 = vmul.f32 0.0001, %v1406_v60 }
 0x7ba   : > { %v843_v46 = vadd.f32 %v842_v45, %v820_v44 }
 0x7bc   : > { %v844_v48 = vmul.f32 %v843_v46, %v843_v46  ;;  %v867_v33 = vpack.c.bf16 %v843_v46, %v843_v46  ;;  %v846_v51 = vmul.f32 0.0, %v843_v46  ;;  %v912_v17 = vmul.f32 0.7, %v843_v46 }
 0x7be   : > { %v845_v50 = vsub.f32 1.08, %v844_v48  ;;  %1332 = vmatmul.mubr.bf16.vlgmr.msra.gmra.mrb[12].mxu1 %v867_v33 }
 0x7c0   : > { %v847_v52 = vadd.f32 %v846_v51, %v845_v50 }
 0x7c2   : > { %v848_v53 = vmul.f32 %v847_v52, %v843_v46 }
 0x7c4   : > { %v849_v54 = vmul.f32 25.0, %v848_v53 }
 0x7c6   : > { %v850_v56 = vmul.f32 -0.0001, %v849_v54 }
 0x7c8   : > { %v853_v57 = vmul.f32 %v850_v56, %v837_v40  ;;  %v864_v58 = vmul.f32 %v861_v55, %v850_v56 }
 0x7ca   : > { %v865_v59 = vadd.f32 %v864_v58, %v773_v19  ;;  %v854_v3 = vadd.f32 %v853_v57, %v852_v0 }
 0x7cc   : > { %v862_v6 = vmul.f32 %v861_v55, %v854_v3 }
 0x7ce   : > { %v863_v10 = vadd.f32 %v862_v6, %v771_v39 }
 0x891   : > { %v902_v47 = vpop.f32.mrb[12].mxu1 }
 0x892   : > { %v909_v61 = vrot.slane %v902_v47, 1  ;;  %v1333_v62 = vpop.f32.mrb[13].mxu1 }
 0x893   : > { %v905_v63 = vpop.f32.mrb[14].mxu1 }
 0x894   : > { %v911_v1 = vadd.f32 %v909_v61, %v1779_v49  ;;  %v1334_v2 = vpop.f32.mrb[15].mxu1 }
 0x896   : > { %v914_v4 = vcombine.high %v911_v1, %v911_v1 }
 0x898   : > { %v921_v5 = vrot.slane %v914_v4, %v1812_v26 }
 0x89a   : > { %v922_v7 = vcombine.high %v921_v5, %v921_v5 }
 0x89c   : > { %v929_v8 = vrot.slane %v922_v7, %v1812_v26 }
 0x89e   : > { %v930_v11 = vcombine.high %v929_v8, %v929_v8 }
 0x8a0   : > { %v932_v12 = vmul.f32 %v930_v11, %v863_v10 }
 0x8a2   : > { %v933_v15 = vadd.f32 %v932_v12, %v865_v59 }
 0x8a4   : > { %1407 = vtanh.f32 %v933_v15 }
 0x8a5   : > { %1409 = vrcp.f32 %v863_v10 }
 0x8ae   : > { %v1408_v16 = vpop.eup %1407 }
 0x8af   : > { %v935_v49 = vmul.f32 0.3, %v1408_v16  ;;  %v1410_v30 = vpop.eup %1409 }
 0x8b0   : > { %v945_v34 = vmul.f32 0.0001, %v1410_v30 }
 0x8b1   : > { %v936_v19 = vadd.f32 %v935_v49, %v912_v17  }
 0x8b3   : > { %v937_v20 = vmul.f32 %v936_v19, %v936_v19  ;;  %v939_v24 = vmul.f32 0.0, %v936_v19  ;;  %959 = vst [vmem:[#allocation2] sm:$0x1] (%p236_p4), %v936_v19 }
 0x8b5   : > { %v938_v21 = vsub.f32 1.08, %v937_v20 }
 0x8b7   : > { %v940_v27 = vadd.f32 %v939_v24, %v938_v21 }
 0x8b9   : > { %v941_v26 = vmul.f32 %v940_v27, %v936_v19 }
 0x8bb   : > { %v942_v29 = vmul.f32 25.0, %v941_v26 }
 0x8bd   : > { %v943_v32 = vmul.f32 -0.0001, %v942_v29 }
 0x8bf   : > { %v946_v35 = vmul.f32 %v943_v32, %v930_v11  ;;  %v957_v36 = vmul.f32 %v954_v31, %v943_v32  ;;  %v1992_v32 = vmov %v936_v19 }
 0x8c1   : > { %v947_v37 = vadd.f32 %v946_v35, %v945_v34  ;;  %v958_v38 = vadd.f32 %v957_v36, %v865_v59   ;;  %238 = sbr.rel (!%p236_p4) target bundleno = 250 (0xfa), region = 88 }
 0x8c3   : > { %v955_v39 = vmul.f32 %v954_v31, %v947_v37  ;;  %v1990_v34 = vmov %v958_v38  ;;  %966 = vst [vmem:[#allocation10] sm:$0x1] (%p236_p4), %v958_v38  ;;  %961 = vst [vmem:[#allocation4] sm:$0x1] (%p236_p4), %v958_v38  ;;  %v976_v44 = vsub.f32 (%p236_p4), %v958_v38, %v975_v42 }
 0x8c5   : > { %v956_v40 = vadd.f32 %v955_v39, %v863_v10   ;;  %v985_v46 = vmul.f32 (%p236_p4), %v976_v44, %v976_v44 }
 0x8c7   : > { %v1991_v33 = vmov %v956_v40  ;;  %960 = vst [vmem:[#allocation3] sm:$0x1] (%p236_p4), %v956_v40  ;;  %965 = vst [vmem:[#allocation9] sm:$0x1] (%p236_p4), %v956_v40  ;;  %v973_v43 = vsub.f32 (%p236_p4), %v956_v40, %v972_v41  ;;  %v986_v9 = vsel (%p236_p4), %vm979_vm3, %v985_v46, 0.0 }
 0x8c9   :  { %v978_v45 = vmul.f32 %v973_v43, %v973_v43 }
 0x8cb   :  { %v980_v48 = vsel %vm979_vm3, %v978_v45, 0.0 }
 0x8cc   :  { %981 = vadd.xlane.f32.xlu0 %v980_v48 }
 0x8d0   :  { %987 = vadd.xlane.f32.xlu0 %v986_v9 }
 0x8d1   :  { %1444 = shalt.err (!%p1441_p9)
}
 0x8d2   :  { %s1445_s10 = scalar_lea.hbm %s1987_s7, 16 }
 0x8d3   :  { %p1446_p10 = scmp.ne.s32.totalorder %s1987_s7, %s1445_s10  ;;  %p1449_p11 = scmp.lt.u32.totalorder %s1445_s10, %s1987_s7 }
 0x8d5   :  { %p1451_p12 = pnand %p1449_p11, %p1446_p10 }
 0x8d7   :  { %1454 = shalt.err (!%p1451_p12)
}
 0x8d8   :  { %1009 = dma.vmem_to_hbm [thread:$0]  %s1007_s3, 16, %s1987_s7, [#allocation11]  }
 0x8d9   :  { %s1455_s16 = scalar_lea.vmem %s997_s2, 16  ;;  %s1459_s17 = scalar_lea.vmem %s997_s2, 32 }
 0x8da   :  { %p1456_p13 = scmp.ne.s32.totalorder %s997_s2, %s1455_s16  ;;  %p1460_p0 = scmp.lt.s32.totalorder %s997_s2, %s997_s2 }
 0x8db   :  { %p1461_p1 = scmp.lt.s32.totalorder %s1459_s17, %s1455_s16 }
 0x8dd   :  { %p1462_p2 = por %p1461_p1, %p1460_p0 }
 0x8df   :  { %p1463_p3 = pnand %p1462_p2, %p1456_p13 }
 0x8e1   :  { %1466 = shalt.err (!%p1463_p3)
}
 0x8e2   :  { %s1467_s20 = scalar_lea.hbm %s1986_s6, 16 }
 0x8e3   :  { %p1468_p4 = scmp.ne.s32.totalorder %s1986_s6, %s1467_s20  ;;  %p1471_p5 = scmp.lt.u32.totalorder %s1467_s20, %s1986_s6 }
 0x8e5   :  { %p1473_p6 = pnand %p1471_p5, %p1468_p4 }
 0x8e7   :  { %1476 = shalt.err (!%p1473_p6)
}
 0x8e8   :  { %999 = dma.vmem_to_hbm [thread:$0]  %s997_s2, 16, %s1986_s6, [#allocation8]   ;;  %vm983_vm4 = vcmask 0  }
 0x8e9   :  { %s1569_s26 = smov [#allocation12]   ;;  %s1570_s0 = smov [#allocation13]  }
 0x8ea   :  { %s1016_s27 = sshll.u32 %s1569_s26, 4  ;;  %s1026_s3 = sshll.u32 %s1570_s0, 4  ;;  %s1017_s27 = int_to_ptr.vmem [resolvable:$true] %s1016_s27  ;;  %s1027_s3 = int_to_ptr.vmem [resolvable:$true] %s1026_s3 }
 0x8eb   :  { %s1477_s28 = scalar_lea.vmem %s1017_s27, 16  ;;  %s1481_s4 = scalar_lea.vmem %s1017_s27, 32 }
 0x8ec   :  { %p1478_p7 = scmp.ne.s32.totalorder %s1017_s27, %s1477_s28  ;;  %p1482_p8 = scmp.lt.s32.totalorder %s1017_s27, %s1017_s27 }
 0x8ed   :  { %p1483_p9 = scmp.lt.s32.totalorder %s1481_s4, %s1477_s28 }
 0x8ef   :  { %p1484_p10 = por %p1483_p9, %p1482_p8 }
 0x8f1   :  { %p1485_p11 = pnand %p1484_p10, %p1478_p7 }
 0x959   :  { %v982_v13 = vpop.xlane.xlu0 %981 }
 0x95a   :  { %984 = vst.msk [vmem:[#allocation12] sm:$0x1] %vm983_vm4, %v982_v13 }
 0x95b   :  { %1488 = shalt.err (!%p1485_p11)
}
 0x95c   :  { %s1489_s6 = scalar_lea.hbm %s1988_s8, 16 }
 0x95d   :  { %p1490_p12 = scmp.ne.s32.totalorder %s1988_s8, %s1489_s6  ;;  %p1493_p13 = scmp.lt.u32.totalorder %s1489_s6, %s1988_s8 }
 0x95f   :  { %p1495_p0 = pnand %p1493_p13, %p1490_p12 }
 0x961   :  { %1498 = shalt.err (!%p1495_p0)
}
 0x962   :  { %1019 = dma.vmem_to_hbm [thread:$0]  %s1017_s27, 16, %s1988_s8, [#allocation11]   ;;  %v988_v14 = vpop.xlane.xlu0 %987 }
 0x963   :  { %989 = vst.msk [vmem:[#allocation13] sm:$0x1] %vm983_vm4, %v988_v14  ;;  %s1499_s1 = scalar_lea.vmem %s1027_s3, 16  ;;  %s1503_s14 = scalar_lea.vmem %s1027_s3, 32 }
 0x964   :  { %p1500_p1 = scmp.ne.s32.totalorder %s1027_s3, %s1499_s1  ;;  %p1504_p2 = scmp.lt.s32.totalorder %s1027_s3, %s1027_s3 }
 0x965   :  { %p1505_p3 = scmp.lt.s32.totalorder %s1503_s14, %s1499_s1 }
 0x967   :  { %p1506_p4 = por %p1505_p3, %p1504_p2 }
 0x969   :  { %p1507_p5 = pnand %p1506_p4, %p1500_p1 }
 0x96b   :  { %1510 = shalt.err (!%p1507_p5)
}
 0x96c   :  { %s1511_s17 = scalar_lea.hbm %s1989_s9, 16 }
 0x96d   :  { %p1512_p6 = scmp.ne.s32.totalorder %s1989_s9, %s1511_s17  ;;  %p1515_p7 = scmp.lt.u32.totalorder %s1511_s17, %s1989_s9 }
 0x96f   :  { %p1517_p8 = pnand %p1515_p7, %p1512_p6 }
 0x971   :  { %1520 = shalt.err (!%p1517_p8)
}
 0x972   :  { %1029 = dma.vmem_to_hbm [thread:$0]  %s1027_s3, 16, %s1989_s9, [#allocation14]  }
 0x973   :  { %1539 = dma.done.wait [#allocation8], 16  }
 0x974   :  { %1540 = vsyncadd [#allocation8], 4294967280 }
 0x975   :  { %1541 = dma.done.wait [#allocation11], 32  }
 0x976   :  { %1542 = vsyncadd [#allocation11], 4294967264 }
 0x977   :  { %1543 = dma.done.wait [#allocation14], 16  }
 0x978   :  { %1544 = vsyncadd [#allocation14], 4294967280 }
 0x979   :  { %1042 = vsyncpa [#allocation7], 1 }
 0x97a   :  { %1043 = vsyncpa [#allocation8], 1 }
 0x97b   :  { %1044 = vsyncpa [#allocation11], 1 }
 0x97c   :  { %1045 = vsyncpa [#allocation14], 1 }

</bundles_post_ra>
